<compile_context>
chip_gen: v7x
topology: tpu7x:2x2x1
jax: 0.10.0
libtpu: 0.0.40
codegen_flags: <defaults>
</compile_context>

<pallas_src>
import functools

import jax
import jax.numpy as jnp
from jax import lax
from jax.experimental import pallas as pl
from jax.experimental.pallas import tpu as pltpu


def gru_classifier_kernel(gi_ref, lens_ref, whh_ref, bhh_n_ref, wfc_ref, bfc_ref,
                          out_ref, h_ref):
    t_blk = pl.program_id(1)
    n_tblk = pl.num_programs(1)
    TC, B, G = gi_ref.shape       # time_block, batch_block, 6H
    HH = G // 3                   # 2H : concatenated [fwd|bwd] hidden width
    H = HH // 2
    T_total = n_tblk * TC         # padded total sequence length

    # Zero the carried hidden state at the first time block of each batch block.
    @pl.when(t_blk == 0)
    def _():
        h_ref[...] = jnp.zeros_like(h_ref)

    # Hoist all weight / bias / mask reads & broadcasts out of the serial recurrence.
    whh = whh_ref[...]                                            # (2H, 6H) fused recurrent W
    bhh_n = jnp.broadcast_to(bhh_n_ref[...], (B, HH)).astype(jnp.float32)  # broadcast once
    lens = lens_ref[...]                                          # (B, 1) int32 (0 => pad row)
    col = lax.broadcasted_iota(jnp.int32, (B, HH), 1)
    fwd_lane = (col < H).astype(jnp.float32)                      # 1.0 on forward lanes
    bwd_lane = 1.0 - fwd_lane

    h = h_ref[...]                                                # (B, 2H) f32 register carry

    # Fully-unrolled recurrence within the time block (TC is static and bounded by the
    # wrapper's block-size choice), hidden state carried in vregs.
    for tl in range(TC):
        t = t_blk * TC + tl
        # One fused recurrent matmul for both directions (the only MXU op on the serial
        # path); h cast to the weight dtype, accumulation in f32.
        gh = jnp.dot(h.astype(whh.dtype), whh,
                     preferred_element_type=jnp.float32)          # (B, 6H)
        gi_t = gi_ref[tl].astype(jnp.float32)                     # (B, 6H)
        # Single sigmoid over the combined [r|z] slab of both directions.
        rz = jax.nn.sigmoid(gi_t[:, : 2 * HH] + gh[:, : 2 * HH])  # (B, 4H)
        r = rz[:, :HH]
        z = rz[:, HH:]
        n = jnp.tanh(gi_t[:, 2 * HH:] + r * (gh[:, 2 * HH:] + bhh_n))   # (B, 2H)
        h_new = (1.0 - z) * n + z * h
        # pack_padded_sequence masking: fwd freezes after its last valid step, bwd stays
        # zero until it reaches the tail.  Two (B,1) compares blended with precomputed
        # {0,1} lane masks (no per-step (B,2H) int tensor, exact freeze since m in {0,1}).
        m = (fwd_lane * (lens > t).astype(jnp.float32)
             + bwd_lane * (lens > (T_total - 1 - t)).astype(jnp.float32))
        h = m * h_new + (1.0 - m) * h

    h_ref[...] = h

    # FC epilogue at the last time block: wfc is pre-permuted in the wrapper so that
    # [h_f|h_b] @ wfc == concat([h_bwd, h_fwd]) @ fc.weight.T, and padded to a
    # lane-dense width so the store is unmasked.
    @pl.when(t_blk == n_tblk - 1)
    def _():
        wfc = wfc_ref[...]
        out_ref[...] = (jnp.dot(h.astype(wfc.dtype), wfc,
                                preferred_element_type=jnp.float32)
                        + bfc_ref[...])


def _round_up(x, m):
    return -(-x // m) * m


def _pick_batch_block(B, target=256, g=16):
    """Batch rows per grid block: big enough to fill MXU rows, >=2 blocks when possible
    (so v7x's two TensorCores both get work), multiple of 16 sublanes (bf16-safe)."""
    Bpg = _round_up(max(B, 1), g)
    if Bpg <= g:
        return g
    if Bpg <= 2 * target:
        return min(target, _round_up(-(-Bpg // 2), g))
    return target


def _pick_time_block(T, batch_block, H, itemsize, target_bytes=2 << 20, max_unroll=32):
    """Time steps per grid block: bound the gi block bytes and the unroll length."""
    per_step = batch_block * 6 * H * itemsize
    return int(max(1, min(T, max_unroll, target_bytes // max(per_step, 1))))


@functools.partial(jax.jit, static_argnames=("compute_dtype",))
def rnn_classifier_forward(tokens, seq_lengths, params, *, compute_dtype=jnp.bfloat16):
    """tokens: (B, T) int32, seq_lengths: (B,) int — returns (B, output_size) f32."""
    B, T = tokens.shape
    E = params["embedding"]
    V, H = E.shape
    O = params["fc_w"].shape[1]
    cdt = compute_dtype
    itemsize = jnp.dtype(cdt).itemsize

    # --- cuDNN-style split: precompute the per-token input-gate projections for both
    # directions.  Vocab-aware: tiny vocab -> fold into the table once and gather;
    # otherwise gather the embeddings first and project only the used tokens.
    wih = jnp.concatenate([params["wih_f"], params["wih_b"]], axis=1)     # (H, 6H)
    bih = jnp.concatenate([params["bih_f"], params["bih_b"]], axis=1)     # (1, 6H)
    if V <= B * T:
        gi_all = (jnp.dot(E, wih) + bih)[tokens]                          # (B, T, 6H)
    else:
        gi_all = jnp.dot(E[tokens], wih) + bih                            # (B, T, 6H)
    gi_f = jnp.transpose(gi_all[..., : 3 * H], (1, 0, 2))                 # (T, B, 3H)
    gi_b = jnp.transpose(gi_all[..., 3 * H:], (1, 0, 2))[::-1]            # reversed time

    # --- Block sizes and time padding (fwd pads the tail, bwd pads the head so kernel
    # step t always corresponds to original timestep T_pad-1-t for the backward dir).
    batch_block = _pick_batch_block(B)
    t_chunk = _pick_time_block(T, batch_block, H, itemsize)
    T_pad = _round_up(T, t_chunk)
    pad_t = T_pad - T
    if pad_t:
        gi_f = jnp.pad(gi_f, ((0, pad_t), (0, 0), (0, 0)))
        gi_b = jnp.pad(gi_b, ((pad_t, 0), (0, 0), (0, 0)))

    # --- Gate-interleaved input preactivations [r_f|r_b|z_f|z_b|n_f|n_b]; recurrent
    # r/z biases folded in (the n-gate recurrent bias is gated by r, so it stays a
    # separate f32 kernel input).  Cast the big stream to the compute dtype.
    bhh_f, bhh_b = params["bhh_f"], params["bhh_b"]
    gi = jnp.concatenate([
        gi_f[..., 0:H] + bhh_f[:, 0:H],
        gi_b[..., 0:H] + bhh_b[:, 0:H],
        gi_f[..., H:2 * H] + bhh_f[:, H:2 * H],
        gi_b[..., H:2 * H] + bhh_b[:, H:2 * H],
        gi_f[..., 2 * H:],
        gi_b[..., 2 * H:],
    ], axis=-1).astype(cdt)                                               # (T_pad, B, 6H)

    # --- Fused block-diagonal recurrent weight (2H, 6H), gate-interleaved columns.
    # (Fine while 2H fits one MXU K pass; split per-direction if H grows past ~128.)
    wf, wb = params["whh_f"], params["whh_b"]                             # (H, 3H) [r|z|n]
    Z = jnp.zeros((H, H), jnp.float32)
    whh = jnp.concatenate([
        jnp.concatenate([wf[:, 0:H], Z, wf[:, H:2 * H], Z, wf[:, 2 * H:], Z], axis=1),
        jnp.concatenate([Z, wb[:, 0:H], Z, wb[:, H:2 * H], Z, wb[:, 2 * H:]], axis=1),
    ], axis=0).astype(cdt)                                                # (2H, 6H)
    bhh_n = jnp.concatenate([bhh_f[:, 2 * H:], bhh_b[:, 2 * H:]],
                            axis=1).astype(jnp.float32)                   # (1, 2H)

    # --- FC weight permuted so the carried [h_f|h_b] multiplies it directly (PyTorch
    # concatenates [h_bwd, h_fwd]); padded to a lane-dense 128-wide output slab.
    O_pad = _round_up(max(O, 1), 128)
    fc_w = params["fc_w"]                                                 # (2H, O)
    fc_w_perm = jnp.concatenate([fc_w[H:], fc_w[:H]], axis=0)
    fc_w_perm = jnp.pad(fc_w_perm, ((0, 0), (0, O_pad - O))).astype(cdt)  # (2H, O_pad)
    fc_b = jnp.pad(params["fc_b"], ((0, 0), (0, O_pad - O))).astype(jnp.float32)

    # --- Pad batch to a multiple of the batch block; padded rows get length 0 so they
    # never update and are sliced off after the call.
    Bp = _round_up(B, batch_block)
    pad_b = Bp - B
    lens = seq_lengths.astype(jnp.int32).reshape(B, 1)
    if pad_b:
        gi = jnp.pad(gi, ((0, 0), (0, pad_b), (0, 0)))
        lens = jnp.pad(lens, ((0, pad_b), (0, 0)))

    # --- Explicit VMEM budget (double-buffered inputs/outputs + h scratch), important
    # once blocks grow on v7x's 64 MiB VMEM.
    gi_blk = t_chunk * batch_block * 6 * H * itemsize
    const_bytes = (2 * H * 6 * H + 2 * H * O_pad) * itemsize + (2 * H + O_pad + batch_block) * 4
    est = 2 * (gi_blk + const_bytes + batch_block * O_pad * 4) + batch_block * 2 * H * 4
    vmem_limit = int(min(max(4 * est, 8 << 20), 64 << 20))

    grid = (Bp // batch_block, T_pad // t_chunk)
    out = pl.pallas_call(
        gru_classifier_kernel,
        out_shape=jax.ShapeDtypeStruct((Bp, O_pad), jnp.float32),
        grid_spec=pltpu.PrefetchScalarGridSpec(
            num_scalar_prefetch=0,
            grid=grid,
            in_specs=[
                pl.BlockSpec((t_chunk, batch_block, 6 * H), lambda b, t: (t, b, 0)),  # gi
                pl.BlockSpec((batch_block, 1), lambda b, t: (b, 0)),                  # lens
                pl.BlockSpec((2 * H, 6 * H), lambda b, t: (0, 0)),                    # whh
                pl.BlockSpec((1, 2 * H), lambda b, t: (0, 0)),                        # bhh_n
                pl.BlockSpec((2 * H, O_pad), lambda b, t: (0, 0)),                    # fc_w
                pl.BlockSpec((1, O_pad), lambda b, t: (0, 0)),                        # fc_b
            ],
            out_specs=pl.BlockSpec((batch_block, O_pad), lambda b, t: (b, 0)),
            scratch_shapes=[pltpu.VMEM((batch_block, 2 * H), jnp.float32)],           # h carry
        ),
        compiler_params=pltpu.CompilerParams(
            # Independent batch chunks -> shard across both TensorCores on v7x; the
            # time axis is a sequential carry, so "arbitrary".
            dimension_semantics=("parallel", "arbitrary"),
            vmem_limit_bytes=vmem_limit),
    )(gi, lens, whh, bhh_n, fc_w_perm, fc_b)
    return out[:B, :O]


def rnn_classifier_reference(tokens, seq_lengths, params):
    """Pure-JAX reference mirroring the PyTorch module (packed bi-GRU + Linear)."""
    emb = params["embedding"][tokens]            # (B, T, H)
    x = jnp.transpose(emb, (1, 0, 2))            # (T, B, H)
    T, B, H = x.shape
    lens = seq_lengths.astype(jnp.int32).reshape(B, 1)

    def cell(x_t, h, wih, whh, bih, bhh):
        gi = x_t @ wih + bih
        gh = h @ whh + bhh
        r = jax.nn.sigmoid(gi[:, :H] + gh[:, :H])
        z = jax.nn.sigmoid(gi[:, H:2 * H] + gh[:, H:2 * H])
        n = jnp.tanh(gi[:, 2 * H:] + r * gh[:, 2 * H:])
        return (1.0 - z) * n + z * h

    h_f = jnp.zeros((B, H), jnp.float32)
    h_b = jnp.zeros((B, H), jnp.float32)
    for t in range(T):
        h_f = jnp.where(lens > t,
                        cell(x[t], h_f, params["wih_f"], params["whh_f"],
                             params["bih_f"], params["bhh_f"]), h_f)
        tb = T - 1 - t
        h_b = jnp.where(lens > tb,
                        cell(x[tb], h_b, params["wih_b"], params["whh_b"],
                             params["bih_b"], params["bhh_b"]), h_b)
    hidden_cat = jnp.concatenate([h_b, h_f], axis=1)         # [h_bwd, h_fwd]
    return hidden_cat @ params["fc_w"] + params["fc_b"]


def init_params(key, input_size, hidden_size, output_size):
    H, O = hidden_size, output_size
    ks = jax.random.split(key, 12)
    s = 1.0 / jnp.sqrt(jnp.float32(H))
    u = lambda k, shape: jax.random.uniform(k, shape, jnp.float32, -s, s)
    return {
        # nn.Embedding(input_size, hidden_size) ~ N(0, 1)
        "embedding": jax.random.normal(ks[0], (input_size, H), jnp.float32),
        # GRU forward direction (weights stored pre-transposed: (in, 3H), gates [r|z|n])
        "wih_f": u(ks[1], (H, 3 * H)),
        "whh_f": u(ks[2], (H, 3 * H)),
        "bih_f": u(ks[3], (1, 3 * H)),
        "bhh_f": u(ks[4], (1, 3 * H)),
        # GRU backward direction
        "wih_b": u(ks[5], (H, 3 * H)),
        "whh_b": u(ks[6], (H, 3 * H)),
        "bih_b": u(ks[7], (1, 3 * H)),
        "bhh_b": u(ks[8], (1, 3 * H)),
        # fc: Linear(2H, O), stored as (2H, O); rows 0:H act on h_bwd, H:2H on h_fwd
        "fc_w": u(ks[9], (2 * H, O)),
        "fc_b": u(ks[10], (1, O)),
    }


if __name__ == "__main__":
    # Shapes consistent with the module's forward:
    #   input_size (vocab) = 16, hidden_size = 32, output_size = 4, batch = 4, seq = 8
    VOCAB, HIDDEN, OUT = 16, 32, 4
    B, T = 4, 8

    key = jax.random.PRNGKey(0)
    k_tok, k_par = jax.random.split(key)

    tokens = jax.random.randint(k_tok, (B, T), 0, VOCAB, dtype=jnp.int32)   # (B, T)
    # pack_padded_sequence requires lengths sorted in decreasing order
    seq_lengths = jnp.array([8, 6, 5, 3], dtype=jnp.int32)                  # (B,)

    params = init_params(k_par, VOCAB, HIDDEN, OUT)
    ref = rnn_classifier_reference(tokens, seq_lengths, params)

    # f32 compute path: tight check against the pure-JAX reference.
    out_f32 = rnn_classifier_forward(tokens, seq_lengths, params,
                                     compute_dtype=jnp.float32)
    jax.block_until_ready(out_f32)
    assert out_f32.shape == (B, OUT) and out_f32.dtype == jnp.float32
    diff32 = float(jnp.max(jnp.abs(out_f32 - ref)))
    assert jnp.allclose(out_f32, ref, atol=1e-2, rtol=1e-2), f"f32 max abs diff {diff32}"

    # bf16 streaming path (default): gi/whh/fc_w in bf16, activations & accumulation in
    # f32 — looser tolerance since the folded biases are rounded to bf16.
    out_bf16 = rnn_classifier_forward(tokens, seq_lengths, params,
                                      compute_dtype=jnp.bfloat16)
    jax.block_until_ready(out_bf16)
    assert out_bf16.shape == (B, OUT) and out_bf16.dtype == jnp.float32
    diffbf = float(jnp.max(jnp.abs(out_bf16 - ref)))
    assert jnp.allclose(out_bf16, ref, atol=1.5e-1, rtol=1.5e-1), \
        f"bf16 max abs diff {diffbf}"

    print("KERNEL_OK")
</pallas_src>

<mosaic_0001>
module attributes {stable_mosaic.version = 11 : i64} {
  func.func @gru_classifier_kernel(%arg0: i32, %arg1: i32, %arg2: memref<8x16x192xf32, #tpu.memory_space<vmem>>, %arg3: memref<16x1xi32, #tpu.memory_space<vmem>>, %arg4: memref<64x192xf32, #tpu.memory_space<vmem>>, %arg5: memref<1x64xf32, #tpu.memory_space<vmem>>, %arg6: memref<64x128xf32, #tpu.memory_space<vmem>>, %arg7: memref<1x128xf32, #tpu.memory_space<vmem>>, %arg8: memref<16x128xf32, #tpu.memory_space<vmem>>, %arg9: memref<16x64xf32, #tpu.memory_space<vmem>>) attributes {dimension_semantics = [#tpu.dimension_semantics<parallel>, #tpu.dimension_semantics<arbitrary>], iteration_bounds = array<i64: 1, 1>, scalar_prefetch = 0 : i64, scratch_operands = 1 : i64, tpu.core_type = #tpu.core_type<tc>, window_params = [{transform_indices = @transform_0, window_bounds = array<i64: 8, 16, 192>}, {transform_indices = @transform_1, window_bounds = array<i64: 16, 1>}, {pipeline_mode = #tpu.pipeline_mode<synchronous>, transform_indices = @transform_2, window_bounds = array<i64: 64, 192>}, {pipeline_mode = #tpu.pipeline_mode<synchronous>, transform_indices = @transform_3, window_bounds = array<i64: 1, 64>}, {pipeline_mode = #tpu.pipeline_mode<synchronous>, transform_indices = @transform_4, window_bounds = array<i64: 64, 128>}, {pipeline_mode = #tpu.pipeline_mode<synchronous>, transform_indices = @transform_5, window_bounds = array<i64: 1, 128>}, {transform_indices = @transform_6, window_bounds = array<i64: 16, 128>}]} {
    %c0_i32 = arith.constant 0 : i32
    %0 = arith.cmpi eq, %arg1, %c0_i32 : i32
    %1 = arith.extui %0 : i1 to i32
    %c0_i32_0 = arith.constant 0 : i32
    %2 = arith.cmpi ne, %1, %c0_i32_0 : i32
    scf.if %2 {
      %cst_77 = arith.constant 0.000000e+00 : f32
      %380 = vector.broadcast %cst_77 : f32 to vector<16x64xf32>
      %c0_78 = arith.constant 0 : index
      %c0_79 = arith.constant 0 : index
      %381 = vector.load %arg9[%c0_78, %c0_79] : memref<16x64xf32, #tpu.memory_space<vmem>>, vector<16x64xf32>
      tpu.vector_store %arg9[%c0_78, %c0_79], %380 {strides = array<i32>} : memref<16x64xf32, #tpu.memory_space<vmem>>, vector<16x64xf32>,
    } else {
    }
    %c0 = arith.constant 0 : index
    %c0_1 = arith.constant 0 : index
    %3 = vector.load %arg4[%c0, %c0_1] : memref<64x192xf32, #tpu.memory_space<vmem>>, vector<64x192xf32>
    %c0_2 = arith.constant 0 : index
    %c0_3 = arith.constant 0 : index
    %4 = vector.load %arg5[%c0_2, %c0_3] : memref<1x64xf32, #tpu.memory_space<vmem>>, vector<1x64xf32>
    %5 = vector.shape_cast %4 : vector<1x64xf32> to vector<1x64xf32>
    %6 = vector.broadcast %5 : vector<1x64xf32> to vector<16x64xf32>
    %c0_4 = arith.constant 0 : index
    %c0_5 = arith.constant 0 : index
    %7 = vector.load %arg3[%c0_4, %c0_5] : memref<16x1xi32, #tpu.memory_space<vmem>>, vector<16x1xi32>
    %8 = tpu.iota {dimensions = array<i32: 1>} : vector<16x64xi32>
    %c32_i32 = arith.constant 32 : i32
    %9 = vector.broadcast %c32_i32 : i32 to vector<16x64xi32>
    %10 = arith.cmpi slt, %8, %9 : vector<16x64xi32>
    %11 = arith.extui %10 : vector<16x64xi1> to vector<16x64xi32>
    %12 = arith.sitofp %11 : vector<16x64xi32> to vector<16x64xf32>
    %cst = arith.constant 1.000000e+00 : f32
    %13 = vector.broadcast %cst : f32 to vector<16x64xf32>
    %14 = arith.subf %13, %12 : vector<16x64xf32>
    %c0_6 = arith.constant 0 : index
    %c0_7 = arith.constant 0 : index
    %15 = vector.load %arg9[%c0_6, %c0_7] : memref<16x64xf32, #tpu.memory_space<vmem>>, vector<16x64xf32>
    %c8_i32 = arith.constant 8 : i32
    %16 = arith.muli %arg1, %c8_i32 : i32
    %c0_i32_8 = arith.constant 0 : i32
    %17 = arith.addi %16, %c0_i32_8 : i32
    %cst_9 = arith.constant dense<0.000000e+00> : vector<16x192xf32>
    %18 = tpu.matmul %15, %3, %cst_9 {dimension_numbers = #tpu.dot_dimension_numbers<[1], [0], [0], [1], [0, 0, 1, 1], [], []>} : vector<16x64xf32>, vector<64x192xf32>, vector<16x192xf32> -> vector<16x192xf32>
    %c0_10 = arith.constant 0 : index
    %c0_11 = arith.constant 0 : index
    %c0_12 = arith.constant 0 : index
    %19 = vector.load %arg2[%c0_10, %c0_11, %c0_12] : memref<8x16x192xf32, #tpu.memory_space<vmem>>, vector<1x16x192xf32>
    %20 = vector.shape_cast %19 : vector<1x16x192xf32> to vector<16x192xf32>
    %21 = vector.extract_strided_slice %20 {offsets = [0, 0], sizes = [16, 128], strides = [1, 1]} : vector<16x192xf32> to vector<16x128xf32>
    %22 = vector.extract_strided_slice %18 {offsets = [0, 0], sizes = [16, 128], strides = [1, 1]} : vector<16x192xf32> to vector<16x128xf32>
    %23 = arith.addf %21, %22 : vector<16x128xf32>
    %24 = arith.negf %23 : vector<16x128xf32>
    %25 = math.exp %24 : vector<16x128xf32>
    %cst_13 = arith.constant 1.000000e+00 : f32
    %26 = vector.broadcast %cst_13 : f32 to vector<16x128xf32>
    %27 = arith.addf %26, %25 : vector<16x128xf32>
    %28 = arith.divf %26, %27 : vector<16x128xf32>
    %29 = vector.extract_strided_slice %28 {offsets = [0, 0], sizes = [16, 64], strides = [1, 1]} : vector<16x128xf32> to vector<16x64xf32>
    %30 = vector.extract_strided_slice %28 {offsets = [0, 64], sizes = [16, 64], strides = [1, 1]} : vector<16x128xf32> to vector<16x64xf32>
    %31 = vector.extract_strided_slice %20 {offsets = [0, 128], sizes = [16, 64], strides = [1, 1]} : vector<16x192xf32> to vector<16x64xf32>
    %32 = vector.extract_strided_slice %18 {offsets = [0, 128], sizes = [16, 64], strides = [1, 1]} : vector<16x192xf32> to vector<16x64xf32>
    %33 = arith.addf %32, %6 : vector<16x64xf32>
    %34 = arith.mulf %29, %33 : vector<16x64xf32>
    %35 = arith.addf %31, %34 : vector<16x64xf32>
    %36 = math.tanh %35 : vector<16x64xf32>
    %cst_14 = arith.constant 1.000000e+00 : f32
    %37 = vector.broadcast %cst_14 : f32 to vector<16x64xf32>
    %38 = arith.subf %37, %30 : vector<16x64xf32>
    %39 = arith.mulf %38, %36 : vector<16x64xf32>
    %40 = arith.mulf %30, %15 : vector<16x64xf32>
    %41 = arith.addf %39, %40 : vector<16x64xf32>
    %42 = vector.broadcast %17 : i32 to vector<16x1xi32>
    %43 = arith.cmpi sgt, %7, %42 : vector<16x1xi32>
    %44 = arith.extui %43 : vector<16x1xi1> to vector<16x1xi32>
    %45 = arith.sitofp %44 : vector<16x1xi32> to vector<16x1xf32>
    %46 = vector.broadcast %45 : vector<16x1xf32> to vector<16x64xf32>
    %47 = arith.mulf %12, %46 : vector<16x64xf32>
    %c7_i32 = arith.constant 7 : i32
    %48 = arith.subi %c7_i32, %17 : i32
    %49 = vector.broadcast %48 : i32 to vector<16x1xi32>
    %50 = arith.cmpi sgt, %7, %49 : vector<16x1xi32>
    %51 = arith.extui %50 : vector<16x1xi1> to vector<16x1xi32>
    %52 = arith.sitofp %51 : vector<16x1xi32> to vector<16x1xf32>
    %53 = vector.broadcast %52 : vector<16x1xf32> to vector<16x64xf32>
    %54 = arith.mulf %14, %53 : vector<16x64xf32>
    %55 = arith.addf %47, %54 : vector<16x64xf32>
    %56 = arith.mulf %55, %41 : vector<16x64xf32>
    %cst_15 = arith.constant 1.000000e+00 : f32
    %57 = vector.broadcast %cst_15 : f32 to vector<16x64xf32>
    %58 = arith.subf %57, %55 : vector<16x64xf32>
    %59 = arith.mulf %58, %15 : vector<16x64xf32>
    %60 = arith.addf %56, %59 : vector<16x64xf32>
    %c8_i32_16 = arith.constant 8 : i32
    %61 = arith.muli %arg1, %c8_i32_16 : i32
    %c1_i32 = arith.constant 1 : i32
    %62 = arith.addi %61, %c1_i32 : i32
    %cst_17 = arith.constant dense<0.000000e+00> : vector<16x192xf32>
    %63 = tpu.matmul %60, %3, %cst_17 {dimension_numbers = #tpu.dot_dimension_numbers<[1], [0], [0], [1], [0, 0, 1, 1], [], []>} : vector<16x64xf32>, vector<64x192xf32>, vector<16x192xf32> -> vector<16x192xf32>
    %c1 = arith.constant 1 : index
    %c0_18 = arith.constant 0 : index
    %c0_19 = arith.constant 0 : index
    %64 = vector.load %arg2[%c1, %c0_18, %c0_19] : memref<8x16x192xf32, #tpu.memory_space<vmem>>, vector<1x16x192xf32>
    %65 = vector.shape_cast %64 : vector<1x16x192xf32> to vector<16x192xf32>
    %66 = vector.extract_strided_slice %65 {offsets = [0, 0], sizes = [16, 128], strides = [1, 1]} : vector<16x192xf32> to vector<16x128xf32>
    %67 = vector.extract_strided_slice %63 {offsets = [0, 0], sizes = [16, 128], strides = [1, 1]} : vector<16x192xf32> to vector<16x128xf32>
    %68 = arith.addf %66, %67 : vector<16x128xf32>
    %69 = arith.negf %68 : vector<16x128xf32>
    %70 = math.exp %69 : vector<16x128xf32>
    %cst_20 = arith.constant 1.000000e+00 : f32
    %71 = vector.broadcast %cst_20 : f32 to vector<16x128xf32>
    %72 = arith.addf %71, %70 : vector<16x128xf32>
    %73 = arith.divf %71, %72 : vector<16x128xf32>
    %74 = vector.extract_strided_slice %73 {offsets = [0, 0], sizes = [16, 64], strides = [1, 1]} : vector<16x128xf32> to vector<16x64xf32>
    %75 = vector.extract_strided_slice %73 {offsets = [0, 64], sizes = [16, 64], strides = [1, 1]} : vector<16x128xf32> to vector<16x64xf32>
    %76 = vector.extract_strided_slice %65 {offsets = [0, 128], sizes = [16, 64], strides = [1, 1]} : vector<16x192xf32> to vector<16x64xf32>
    %77 = vector.extract_strided_slice %63 {offsets = [0, 128], sizes = [16, 64], strides = [1, 1]} : vector<16x192xf32> to vector<16x64xf32>
    %78 = arith.addf %77, %6 : vector<16x64xf32>
    %79 = arith.mulf %74, %78 : vector<16x64xf32>
    %80 = arith.addf %76, %79 : vector<16x64xf32>
    %81 = math.tanh %80 : vector<16x64xf32>
    %cst_21 = arith.constant 1.000000e+00 : f32
    %82 = vector.broadcast %cst_21 : f32 to vector<16x64xf32>
    %83 = arith.subf %82, %75 : vector<16x64xf32>
    %84 = arith.mulf %83, %81 : vector<16x64xf32>
    %85 = arith.mulf %75, %60 : vector<16x64xf32>
    %86 = arith.addf %84, %85 : vector<16x64xf32>
    %87 = vector.broadcast %62 : i32 to vector<16x1xi32>
    %88 = arith.cmpi sgt, %7, %87 : vector<16x1xi32>
    %89 = arith.extui %88 : vector<16x1xi1> to vector<16x1xi32>
    %90 = arith.sitofp %89 : vector<16x1xi32> to vector<16x1xf32>
    %91 = vector.broadcast %90 : vector<16x1xf32> to vector<16x64xf32>
    %92 = arith.mulf %12, %91 : vector<16x64xf32>
    %c7_i32_22 = arith.constant 7 : i32
    %93 = arith.subi %c7_i32_22, %62 : i32
    %94 = vector.broadcast %93 : i32 to vector<16x1xi32>
    %95 = arith.cmpi sgt, %7, %94 : vector<16x1xi32>
    %96 = arith.extui %95 : vector<16x1xi1> to vector<16x1xi32>
    %97 = arith.sitofp %96 : vector<16x1xi32> to vector<16x1xf32>
    %98 = vector.broadcast %97 : vector<16x1xf32> to vector<16x64xf32>
    %99 = arith.mulf %14, %98 : vector<16x64xf32>
    %100 = arith.addf %92, %99 : vector<16x64xf32>
    %101 = arith.mulf %100, %86 : vector<16x64xf32>
    %cst_23 = arith.constant 1.000000e+00 : f32
    %102 = vector.broadcast %cst_23 : f32 to vector<16x64xf32>
    %103 = arith.subf %102, %100 : vector<16x64xf32>
    %104 = arith.mulf %103, %60 : vector<16x64xf32>
    %105 = arith.addf %101, %104 : vector<16x64xf32>
    %c8_i32_24 = arith.constant 8 : i32
    %106 = arith.muli %arg1, %c8_i32_24 : i32
    %c2_i32 = arith.constant 2 : i32
    %107 = arith.addi %106, %c2_i32 : i32
    %cst_25 = arith.constant dense<0.000000e+00> : vector<16x192xf32>
    %108 = tpu.matmul %105, %3, %cst_25 {dimension_numbers = #tpu.dot_dimension_numbers<[1], [0], [0], [1], [0, 0, 1, 1], [], []>} : vector<16x64xf32>, vector<64x192xf32>, vector<16x192xf32> -> vector<16x192xf32>
    %c2 = arith.constant 2 : index
    %c0_26 = arith.constant 0 : index
    %c0_27 = arith.constant 0 : index
    %109 = vector.load %arg2[%c2, %c0_26, %c0_27] : memref<8x16x192xf32, #tpu.memory_space<vmem>>, vector<1x16x192xf32>
    %110 = vector.shape_cast %109 : vector<1x16x192xf32> to vector<16x192xf32>
    %111 = vector.extract_strided_slice %110 {offsets = [0, 0], sizes = [16, 128], strides = [1, 1]} : vector<16x192xf32> to vector<16x128xf32>
    %112 = vector.extract_strided_slice %108 {offsets = [0, 0], sizes = [16, 128], strides = [1, 1]} : vector<16x192xf32> to vector<16x128xf32>
    %113 = arith.addf %111, %112 : vector<16x128xf32>
    %114 = arith.negf %113 : vector<16x128xf32>
    %115 = math.exp %114 : vector<16x128xf32>
    %cst_28 = arith.constant 1.000000e+00 : f32
    %116 = vector.broadcast %cst_28 : f32 to vector<16x128xf32>
    %117 = arith.addf %116, %115 : vector<16x128xf32>
    %118 = arith.divf %116, %117 : vector<16x128xf32>
    %119 = vector.extract_strided_slice %118 {offsets = [0, 0], sizes = [16, 64], strides = [1, 1]} : vector<16x128xf32> to vector<16x64xf32>
    %120 = vector.extract_strided_slice %118 {offsets = [0, 64], sizes = [16, 64], strides = [1, 1]} : vector<16x128xf32> to vector<16x64xf32>
    %121 = vector.extract_strided_slice %110 {offsets = [0, 128], sizes = [16, 64], strides = [1, 1]} : vector<16x192xf32> to vector<16x64xf32>
    %122 = vector.extract_strided_slice %108 {offsets = [0, 128], sizes = [16, 64], strides = [1, 1]} : vector<16x192xf32> to vector<16x64xf32>
    %123 = arith.addf %122, %6 : vector<16x64xf32>
    %124 = arith.mulf %119, %123 : vector<16x64xf32>
    %125 = arith.addf %121, %124 : vector<16x64xf32>
    %126 = math.tanh %125 : vector<16x64xf32>
    %cst_29 = arith.constant 1.000000e+00 : f32
    %127 = vector.broadcast %cst_29 : f32 to vector<16x64xf32>
    %128 = arith.subf %127, %120 : vector<16x64xf32>
    %129 = arith.mulf %128, %126 : vector<16x64xf32>
    %130 = arith.mulf %120, %105 : vector<16x64xf32>
    %131 = arith.addf %129, %130 : vector<16x64xf32>
    %132 = vector.broadcast %107 : i32 to vector<16x1xi32>
    %133 = arith.cmpi sgt, %7, %132 : vector<16x1xi32>
    %134 = arith.extui %133 : vector<16x1xi1> to vector<16x1xi32>
    %135 = arith.sitofp %134 : vector<16x1xi32> to vector<16x1xf32>
    %136 = vector.broadcast %135 : vector<16x1xf32> to vector<16x64xf32>
    %137 = arith.mulf %12, %136 : vector<16x64xf32>
    %c7_i32_30 = arith.constant 7 : i32
    %138 = arith.subi %c7_i32_30, %107 : i32
    %139 = vector.broadcast %138 : i32 to vector<16x1xi32>
    %140 = arith.cmpi sgt, %7, %139 : vector<16x1xi32>
    %141 = arith.extui %140 : vector<16x1xi1> to vector<16x1xi32>
    %142 = arith.sitofp %141 : vector<16x1xi32> to vector<16x1xf32>
    %143 = vector.broadcast %142 : vector<16x1xf32> to vector<16x64xf32>
    %144 = arith.mulf %14, %143 : vector<16x64xf32>
    %145 = arith.addf %137, %144 : vector<16x64xf32>
    %146 = arith.mulf %145, %131 : vector<16x64xf32>
    %cst_31 = arith.constant 1.000000e+00 : f32
    %147 = vector.broadcast %cst_31 : f32 to vector<16x64xf32>
    %148 = arith.subf %147, %145 : vector<16x64xf32>
    %149 = arith.mulf %148, %105 : vector<16x64xf32>
    %150 = arith.addf %146, %149 : vector<16x64xf32>
    %c8_i32_32 = arith.constant 8 : i32
    %151 = arith.muli %arg1, %c8_i32_32 : i32
    %c3_i32 = arith.constant 3 : i32
    %152 = arith.addi %151, %c3_i32 : i32
    %cst_33 = arith.constant dense<0.000000e+00> : vector<16x192xf32>
    %153 = tpu.matmul %150, %3, %cst_33 {dimension_numbers = #tpu.dot_dimension_numbers<[1], [0], [0], [1], [0, 0, 1, 1], [], []>} : vector<16x64xf32>, vector<64x192xf32>, vector<16x192xf32> -> vector<16x192xf32>
    %c3 = arith.constant 3 : index
    %c0_34 = arith.constant 0 : index
    %c0_35 = arith.constant 0 : index
    %154 = vector.load %arg2[%c3, %c0_34, %c0_35] : memref<8x16x192xf32, #tpu.memory_space<vmem>>, vector<1x16x192xf32>
    %155 = vector.shape_cast %154 : vector<1x16x192xf32> to vector<16x192xf32>
    %156 = vector.extract_strided_slice %155 {offsets = [0, 0], sizes = [16, 128], strides = [1, 1]} : vector<16x192xf32> to vector<16x128xf32>
    %157 = vector.extract_strided_slice %153 {offsets = [0, 0], sizes = [16, 128], strides = [1, 1]} : vector<16x192xf32> to vector<16x128xf32>
    %158 = arith.addf %156, %157 : vector<16x128xf32>
    %159 = arith.negf %158 : vector<16x128xf32>
    %160 = math.exp %159 : vector<16x128xf32>
    %cst_36 = arith.constant 1.000000e+00 : f32
    %161 = vector.broadcast %cst_36 : f32 to vector<16x128xf32>
    %162 = arith.addf %161, %160 : vector<16x128xf32>
    %163 = arith.divf %161, %162 : vector<16x128xf32>
    %164 = vector.extract_strided_slice %163 {offsets = [0, 0], sizes = [16, 64], strides = [1, 1]} : vector<16x128xf32> to vector<16x64xf32>
    %165 = vector.extract_strided_slice %163 {offsets = [0, 64], sizes = [16, 64], strides = [1, 1]} : vector<16x128xf32> to vector<16x64xf32>
    %166 = vector.extract_strided_slice %155 {offsets = [0, 128], sizes = [16, 64], strides = [1, 1]} : vector<16x192xf32> to vector<16x64xf32>
    %167 = vector.extract_strided_slice %153 {offsets = [0, 128], sizes = [16, 64], strides = [1, 1]} : vector<16x192xf32> to vector<16x64xf32>
    %168 = arith.addf %167, %6 : vector<16x64xf32>
    %169 = arith.mulf %164, %168 : vector<16x64xf32>
    %170 = arith.addf %166, %169 : vector<16x64xf32>
    %171 = math.tanh %170 : vector<16x64xf32>
    %cst_37 = arith.constant 1.000000e+00 : f32
    %172 = vector.broadcast %cst_37 : f32 to vector<16x64xf32>
    %173 = arith.subf %172, %165 : vector<16x64xf32>
    %174 = arith.mulf %173, %171 : vector<16x64xf32>
    %175 = arith.mulf %165, %150 : vector<16x64xf32>
    %176 = arith.addf %174, %175 : vector<16x64xf32>
    %177 = vector.broadcast %152 : i32 to vector<16x1xi32>
    %178 = arith.cmpi sgt, %7, %177 : vector<16x1xi32>
    %179 = arith.extui %178 : vector<16x1xi1> to vector<16x1xi32>
    %180 = arith.sitofp %179 : vector<16x1xi32> to vector<16x1xf32>
    %181 = vector.broadcast %180 : vector<16x1xf32> to vector<16x64xf32>
    %182 = arith.mulf %12, %181 : vector<16x64xf32>
    %c7_i32_38 = arith.constant 7 : i32
    %183 = arith.subi %c7_i32_38, %152 : i32
    %184 = vector.broadcast %183 : i32 to vector<16x1xi32>
    %185 = arith.cmpi sgt, %7, %184 : vector<16x1xi32>
    %186 = arith.extui %185 : vector<16x1xi1> to vector<16x1xi32>
    %187 = arith.sitofp %186 : vector<16x1xi32> to vector<16x1xf32>
    %188 = vector.broadcast %187 : vector<16x1xf32> to vector<16x64xf32>
    %189 = arith.mulf %14, %188 : vector<16x64xf32>
    %190 = arith.addf %182, %189 : vector<16x64xf32>
    %191 = arith.mulf %190, %176 : vector<16x64xf32>
    %cst_39 = arith.constant 1.000000e+00 : f32
    %192 = vector.broadcast %cst_39 : f32 to vector<16x64xf32>
    %193 = arith.subf %192, %190 : vector<16x64xf32>
    %194 = arith.mulf %193, %150 : vector<16x64xf32>
    %195 = arith.addf %191, %194 : vector<16x64xf32>
    %c8_i32_40 = arith.constant 8 : i32
    %196 = arith.muli %arg1, %c8_i32_40 : i32
    %c4_i32 = arith.constant 4 : i32
    %197 = arith.addi %196, %c4_i32 : i32
    %cst_41 = arith.constant dense<0.000000e+00> : vector<16x192xf32>
    %198 = tpu.matmul %195, %3, %cst_41 {dimension_numbers = #tpu.dot_dimension_numbers<[1], [0], [0], [1], [0, 0, 1, 1], [], []>} : vector<16x64xf32>, vector<64x192xf32>, vector<16x192xf32> -> vector<16x192xf32>
    %c4 = arith.constant 4 : index
    %c0_42 = arith.constant 0 : index
    %c0_43 = arith.constant 0 : index
    %199 = vector.load %arg2[%c4, %c0_42, %c0_43] : memref<8x16x192xf32, #tpu.memory_space<vmem>>, vector<1x16x192xf32>
    %200 = vector.shape_cast %199 : vector<1x16x192xf32> to vector<16x192xf32>
    %201 = vector.extract_strided_slice %200 {offsets = [0, 0], sizes = [16, 128], strides = [1, 1]} : vector<16x192xf32> to vector<16x128xf32>
    %202 = vector.extract_strided_slice %198 {offsets = [0, 0], sizes = [16, 128], strides = [1, 1]} : vector<16x192xf32> to vector<16x128xf32>
    %203 = arith.addf %201, %202 : vector<16x128xf32>
    %204 = arith.negf %203 : vector<16x128xf32>
    %205 = math.exp %204 : vector<16x128xf32>
    %cst_44 = arith.constant 1.000000e+00 : f32
    %206 = vector.broadcast %cst_44 : f32 to vector<16x128xf32>
    %207 = arith.addf %206, %205 : vector<16x128xf32>
    %208 = arith.divf %206, %207 : vector<16x128xf32>
    %209 = vector.extract_strided_slice %208 {offsets = [0, 0], sizes = [16, 64], strides = [1, 1]} : vector<16x128xf32> to vector<16x64xf32>
    %210 = vector.extract_strided_slice %208 {offsets = [0, 64], sizes = [16, 64], strides = [1, 1]} : vector<16x128xf32> to vector<16x64xf32>
    %211 = vector.extract_strided_slice %200 {offsets = [0, 128], sizes = [16, 64], strides = [1, 1]} : vector<16x192xf32> to vector<16x64xf32>
    %212 = vector.extract_strided_slice %198 {offsets = [0, 128], sizes = [16, 64], strides = [1, 1]} : vector<16x192xf32> to vector<16x64xf32>
    %213 = arith.addf %212, %6 : vector<16x64xf32>
    %214 = arith.mulf %209, %213 : vector<16x64xf32>
    %215 = arith.addf %211, %214 : vector<16x64xf32>
    %216 = math.tanh %215 : vector<16x64xf32>
    %cst_45 = arith.constant 1.000000e+00 : f32
    %217 = vector.broadcast %cst_45 : f32 to vector<16x64xf32>
    %218 = arith.subf %217, %210 : vector<16x64xf32>
    %219 = arith.mulf %218, %216 : vector<16x64xf32>
    %220 = arith.mulf %210, %195 : vector<16x64xf32>
    %221 = arith.addf %219, %220 : vector<16x64xf32>
    %222 = vector.broadcast %197 : i32 to vector<16x1xi32>
    %223 = arith.cmpi sgt, %7, %222 : vector<16x1xi32>
    %224 = arith.extui %223 : vector<16x1xi1> to vector<16x1xi32>
    %225 = arith.sitofp %224 : vector<16x1xi32> to vector<16x1xf32>
    %226 = vector.broadcast %225 : vector<16x1xf32> to vector<16x64xf32>
    %227 = arith.mulf %12, %226 : vector<16x64xf32>
    %c7_i32_46 = arith.constant 7 : i32
    %228 = arith.subi %c7_i32_46, %197 : i32
    %229 = vector.broadcast %228 : i32 to vector<16x1xi32>
    %230 = arith.cmpi sgt, %7, %229 : vector<16x1xi32>
    %231 = arith.extui %230 : vector<16x1xi1> to vector<16x1xi32>
    %232 = arith.sitofp %231 : vector<16x1xi32> to vector<16x1xf32>
    %233 = vector.broadcast %232 : vector<16x1xf32> to vector<16x64xf32>
    %234 = arith.mulf %14, %233 : vector<16x64xf32>
    %235 = arith.addf %227, %234 : vector<16x64xf32>
    %236 = arith.mulf %235, %221 : vector<16x64xf32>
    %cst_47 = arith.constant 1.000000e+00 : f32
    %237 = vector.broadcast %cst_47 : f32 to vector<16x64xf32>
    %238 = arith.subf %237, %235 : vector<16x64xf32>
    %239 = arith.mulf %238, %195 : vector<16x64xf32>
    %240 = arith.addf %236, %239 : vector<16x64xf32>
    %c8_i32_48 = arith.constant 8 : i32
    %241 = arith.muli %arg1, %c8_i32_48 : i32
    %c5_i32 = arith.constant 5 : i32
    %242 = arith.addi %241, %c5_i32 : i32
    %cst_49 = arith.constant dense<0.000000e+00> : vector<16x192xf32>
    %243 = tpu.matmul %240, %3, %cst_49 {dimension_numbers = #tpu.dot_dimension_numbers<[1], [0], [0], [1], [0, 0, 1, 1], [], []>} : vector<16x64xf32>, vector<64x192xf32>, vector<16x192xf32> -> vector<16x192xf32>
    %c5 = arith.constant 5 : index
    %c0_50 = arith.constant 0 : index
    %c0_51 = arith.constant 0 : index
    %244 = vector.load %arg2[%c5, %c0_50, %c0_51] : memref<8x16x192xf32, #tpu.memory_space<vmem>>, vector<1x16x192xf32>
    %245 = vector.shape_cast %244 : vector<1x16x192xf32> to vector<16x192xf32>
    %246 = vector.extract_strided_slice %245 {offsets = [0, 0], sizes = [16, 128], strides = [1, 1]} : vector<16x192xf32> to vector<16x128xf32>
    %247 = vector.extract_strided_slice %243 {offsets = [0, 0], sizes = [16, 128], strides = [1, 1]} : vector<16x192xf32> to vector<16x128xf32>
    %248 = arith.addf %246, %247 : vector<16x128xf32>
    %249 = arith.negf %248 : vector<16x128xf32>
    %250 = math.exp %249 : vector<16x128xf32>
    %cst_52 = arith.constant 1.000000e+00 : f32
    %251 = vector.broadcast %cst_52 : f32 to vector<16x128xf32>
    %252 = arith.addf %251, %250 : vector<16x128xf32>
    %253 = arith.divf %251, %252 : vector<16x128xf32>
    %254 = vector.extract_strided_slice %253 {offsets = [0, 0], sizes = [16, 64], strides = [1, 1]} : vector<16x128xf32> to vector<16x64xf32>
    %255 = vector.extract_strided_slice %253 {offsets = [0, 64], sizes = [16, 64], strides = [1, 1]} : vector<16x128xf32> to vector<16x64xf32>
    %256 = vector.extract_strided_slice %245 {offsets = [0, 128], sizes = [16, 64], strides = [1, 1]} : vector<16x192xf32> to vector<16x64xf32>
    %257 = vector.extract_strided_slice %243 {offsets = [0, 128], sizes = [16, 64], strides = [1, 1]} : vector<16x192xf32> to vector<16x64xf32>
    %258 = arith.addf %257, %6 : vector<16x64xf32>
    %259 = arith.mulf %254, %258 : vector<16x64xf32>
    %260 = arith.addf %256, %259 : vector<16x64xf32>
    %261 = math.tanh %260 : vector<16x64xf32>
    %cst_53 = arith.constant 1.000000e+00 : f32
    %262 = vector.broadcast %cst_53 : f32 to vector<16x64xf32>
    %263 = arith.subf %262, %255 : vector<16x64xf32>
    %264 = arith.mulf %263, %261 : vector<16x64xf32>
    %265 = arith.mulf %255, %240 : vector<16x64xf32>
    %266 = arith.addf %264, %265 : vector<16x64xf32>
    %267 = vector.broadcast %242 : i32 to vector<16x1xi32>
    %268 = arith.cmpi sgt, %7, %267 : vector<16x1xi32>
    %269 = arith.extui %268 : vector<16x1xi1> to vector<16x1xi32>
    %270 = arith.sitofp %269 : vector<16x1xi32> to vector<16x1xf32>
    %271 = vector.broadcast %270 : vector<16x1xf32> to vector<16x64xf32>
    %272 = arith.mulf %12, %271 : vector<16x64xf32>
    %c7_i32_54 = arith.constant 7 : i32
    %273 = arith.subi %c7_i32_54, %242 : i32
    %274 = vector.broadcast %273 : i32 to vector<16x1xi32>
    %275 = arith.cmpi sgt, %7, %274 : vector<16x1xi32>
    %276 = arith.extui %275 : vector<16x1xi1> to vector<16x1xi32>
    %277 = arith.sitofp %276 : vector<16x1xi32> to vector<16x1xf32>
    %278 = vector.broadcast %277 : vector<16x1xf32> to vector<16x64xf32>
    %279 = arith.mulf %14, %278 : vector<16x64xf32>
    %280 = arith.addf %272, %279 : vector<16x64xf32>
    %281 = arith.mulf %280, %266 : vector<16x64xf32>
    %cst_55 = arith.constant 1.000000e+00 : f32
    %282 = vector.broadcast %cst_55 : f32 to vector<16x64xf32>
    %283 = arith.subf %282, %280 : vector<16x64xf32>
    %284 = arith.mulf %283, %240 : vector<16x64xf32>
    %285 = arith.addf %281, %284 : vector<16x64xf32>
    %c8_i32_56 = arith.constant 8 : i32
    %286 = arith.muli %arg1, %c8_i32_56 : i32
    %c6_i32 = arith.constant 6 : i32
    %287 = arith.addi %286, %c6_i32 : i32
    %cst_57 = arith.constant dense<0.000000e+00> : vector<16x192xf32>
    %288 = tpu.matmul %285, %3, %cst_57 {dimension_numbers = #tpu.dot_dimension_numbers<[1], [0], [0], [1], [0, 0, 1, 1], [], []>} : vector<16x64xf32>, vector<64x192xf32>, vector<16x192xf32> -> vector<16x192xf32>
    %c6 = arith.constant 6 : index
    %c0_58 = arith.constant 0 : index
    %c0_59 = arith.constant 0 : index
    %289 = vector.load %arg2[%c6, %c0_58, %c0_59] : memref<8x16x192xf32, #tpu.memory_space<vmem>>, vector<1x16x192xf32>
    %290 = vector.shape_cast %289 : vector<1x16x192xf32> to vector<16x192xf32>
    %291 = vector.extract_strided_slice %290 {offsets = [0, 0], sizes = [16, 128], strides = [1, 1]} : vector<16x192xf32> to vector<16x128xf32>
    %292 = vector.extract_strided_slice %288 {offsets = [0, 0], sizes = [16, 128], strides = [1, 1]} : vector<16x192xf32> to vector<16x128xf32>
    %293 = arith.addf %291, %292 : vector<16x128xf32>
    %294 = arith.negf %293 : vector<16x128xf32>
    %295 = math.exp %294 : vector<16x128xf32>
    %cst_60 = arith.constant 1.000000e+00 : f32
    %296 = vector.broadcast %cst_60 : f32 to vector<16x128xf32>
    %297 = arith.addf %296, %295 : vector<16x128xf32>
    %298 = arith.divf %296, %297 : vector<16x128xf32>
    %299 = vector.extract_strided_slice %298 {offsets = [0, 0], sizes = [16, 64], strides = [1, 1]} : vector<16x128xf32> to vector<16x64xf32>
    %300 = vector.extract_strided_slice %298 {offsets = [0, 64], sizes = [16, 64], strides = [1, 1]} : vector<16x128xf32> to vector<16x64xf32>
    %301 = vector.extract_strided_slice %290 {offsets = [0, 128], sizes = [16, 64], strides = [1, 1]} : vector<16x192xf32> to vector<16x64xf32>
    %302 = vector.extract_strided_slice %288 {offsets = [0, 128], sizes = [16, 64], strides = [1, 1]} : vector<16x192xf32> to vector<16x64xf32>
    %303 = arith.addf %302, %6 : vector<16x64xf32>
    %304 = arith.mulf %299, %303 : vector<16x64xf32>
    %305 = arith.addf %301, %304 : vector<16x64xf32>
    %306 = math.tanh %305 : vector<16x64xf32>
    %cst_61 = arith.constant 1.000000e+00 : f32
    %307 = vector.broadcast %cst_61 : f32 to vector<16x64xf32>
    %308 = arith.subf %307, %300 : vector<16x64xf32>
    %309 = arith.mulf %308, %306 : vector<16x64xf32>
    %310 = arith.mulf %300, %285 : vector<16x64xf32>
    %311 = arith.addf %309, %310 : vector<16x64xf32>
    %312 = vector.broadcast %287 : i32 to vector<16x1xi32>
    %313 = arith.cmpi sgt, %7, %312 : vector<16x1xi32>
    %314 = arith.extui %313 : vector<16x1xi1> to vector<16x1xi32>
    %315 = arith.sitofp %314 : vector<16x1xi32> to vector<16x1xf32>
    %316 = vector.broadcast %315 : vector<16x1xf32> to vector<16x64xf32>
    %317 = arith.mulf %12, %316 : vector<16x64xf32>
    %c7_i32_62 = arith.constant 7 : i32
    %318 = arith.subi %c7_i32_62, %287 : i32
    %319 = vector.broadcast %318 : i32 to vector<16x1xi32>
    %320 = arith.cmpi sgt, %7, %319 : vector<16x1xi32>
    %321 = arith.extui %320 : vector<16x1xi1> to vector<16x1xi32>
    %322 = arith.sitofp %321 : vector<16x1xi32> to vector<16x1xf32>
    %323 = vector.broadcast %322 : vector<16x1xf32> to vector<16x64xf32>
    %324 = arith.mulf %14, %323 : vector<16x64xf32>
    %325 = arith.addf %317, %324 : vector<16x64xf32>
    %326 = arith.mulf %325, %311 : vector<16x64xf32>
    %cst_63 = arith.constant 1.000000e+00 : f32
    %327 = vector.broadcast %cst_63 : f32 to vector<16x64xf32>
    %328 = arith.subf %327, %325 : vector<16x64xf32>
    %329 = arith.mulf %328, %285 : vector<16x64xf32>
    %330 = arith.addf %326, %329 : vector<16x64xf32>
    %c8_i32_64 = arith.constant 8 : i32
    %331 = arith.muli %arg1, %c8_i32_64 : i32
    %c7_i32_65 = arith.constant 7 : i32
    %332 = arith.addi %331, %c7_i32_65 : i32
    %cst_66 = arith.constant dense<0.000000e+00> : vector<16x192xf32>
    %333 = tpu.matmul %330, %3, %cst_66 {dimension_numbers = #tpu.dot_dimension_numbers<[1], [0], [0], [1], [0, 0, 1, 1], [], []>} : vector<16x64xf32>, vector<64x192xf32>, vector<16x192xf32> -> vector<16x192xf32>
    %c7 = arith.constant 7 : index
    %c0_67 = arith.constant 0 : index
    %c0_68 = arith.constant 0 : index
    %334 = vector.load %arg2[%c7, %c0_67, %c0_68] : memref<8x16x192xf32, #tpu.memory_space<vmem>>, vector<1x16x192xf32>
    %335 = vector.shape_cast %334 : vector<1x16x192xf32> to vector<16x192xf32>
    %336 = vector.extract_strided_slice %335 {offsets = [0, 0], sizes = [16, 128], strides = [1, 1]} : vector<16x192xf32> to vector<16x128xf32>
    %337 = vector.extract_strided_slice %333 {offsets = [0, 0], sizes = [16, 128], strides = [1, 1]} : vector<16x192xf32> to vector<16x128xf32>
    %338 = arith.addf %336, %337 : vector<16x128xf32>
    %339 = arith.negf %338 : vector<16x128xf32>
    %340 = math.exp %339 : vector<16x128xf32>
    %cst_69 = arith.constant 1.000000e+00 : f32
    %341 = vector.broadcast %cst_69 : f32 to vector<16x128xf32>
    %342 = arith.addf %341, %340 : vector<16x128xf32>
    %343 = arith.divf %341, %342 : vector<16x128xf32>
    %344 = vector.extract_strided_slice %343 {offsets = [0, 0], sizes = [16, 64], strides = [1, 1]} : vector<16x128xf32> to vector<16x64xf32>
    %345 = vector.extract_strided_slice %343 {offsets = [0, 64], sizes = [16, 64], strides = [1, 1]} : vector<16x128xf32> to vector<16x64xf32>
    %346 = vector.extract_strided_slice %335 {offsets = [0, 128], sizes = [16, 64], strides = [1, 1]} : vector<16x192xf32> to vector<16x64xf32>
    %347 = vector.extract_strided_slice %333 {offsets = [0, 128], sizes = [16, 64], strides = [1, 1]} : vector<16x192xf32> to vector<16x64xf32>
    %348 = arith.addf %347, %6 : vector<16x64xf32>
    %349 = arith.mulf %344, %348 : vector<16x64xf32>
    %350 = arith.addf %346, %349 : vector<16x64xf32>
    %351 = math.tanh %350 : vector<16x64xf32>
    %cst_70 = arith.constant 1.000000e+00 : f32
    %352 = vector.broadcast %cst_70 : f32 to vector<16x64xf32>
    %353 = arith.subf %352, %345 : vector<16x64xf32>
    %354 = arith.mulf %353, %351 : vector<16x64xf32>
    %355 = arith.mulf %345, %330 : vector<16x64xf32>
    %356 = arith.addf %354, %355 : vector<16x64xf32>
    %357 = vector.broadcast %332 : i32 to vector<16x1xi32>
    %358 = arith.cmpi sgt, %7, %357 : vector<16x1xi32>
    %359 = arith.extui %358 : vector<16x1xi1> to vector<16x1xi32>
    %360 = arith.sitofp %359 : vector<16x1xi32> to vector<16x1xf32>
    %361 = vector.broadcast %360 : vector<16x1xf32> to vector<16x64xf32>
    %362 = arith.mulf %12, %361 : vector<16x64xf32>
    %c7_i32_71 = arith.constant 7 : i32
    %363 = arith.subi %c7_i32_71, %332 : i32
    %364 = vector.broadcast %363 : i32 to vector<16x1xi32>
    %365 = arith.cmpi sgt, %7, %364 : vector<16x1xi32>
    %366 = arith.extui %365 : vector<16x1xi1> to vector<16x1xi32>
    %367 = arith.sitofp %366 : vector<16x1xi32> to vector<16x1xf32>
    %368 = vector.broadcast %367 : vector<16x1xf32> to vector<16x64xf32>
    %369 = arith.mulf %14, %368 : vector<16x64xf32>
    %370 = arith.addf %362, %369 : vector<16x64xf32>
    %371 = arith.mulf %370, %356 : vector<16x64xf32>
    %cst_72 = arith.constant 1.000000e+00 : f32
    %372 = vector.broadcast %cst_72 : f32 to vector<16x64xf32>
    %373 = arith.subf %372, %370 : vector<16x64xf32>
    %374 = arith.mulf %373, %330 : vector<16x64xf32>
    %375 = arith.addf %371, %374 : vector<16x64xf32>
    %c0_73 = arith.constant 0 : index
    %c0_74 = arith.constant 0 : index
    %376 = vector.load %arg9[%c0_73, %c0_74] : memref<16x64xf32, #tpu.memory_space<vmem>>, vector<16x64xf32>
    tpu.vector_store %arg9[%c0_73, %c0_74], %375 {strides = array<i32>} : memref<16x64xf32, #tpu.memory_space<vmem>>, vector<16x64xf32>,
    %c0_i32_75 = arith.constant 0 : i32
    %377 = arith.cmpi eq, %arg1, %c0_i32_75 : i32
    %378 = arith.extui %377 : i1 to i32
    %c0_i32_76 = arith.constant 0 : i32
    %379 = arith.cmpi ne, %378, %c0_i32_76 : i32
    scf.if %379 {
      %c0_77 = arith.constant 0 : index
      %c0_78 = arith.constant 0 : index
      %380 = vector.load %arg6[%c0_77, %c0_78] : memref<64x128xf32, #tpu.memory_space<vmem>>, vector<64x128xf32>
      %cst_79 = arith.constant dense<0.000000e+00> : vector<16x128xf32>
      %381 = tpu.matmul %375, %380, %cst_79 {dimension_numbers = #tpu.dot_dimension_numbers<[1], [0], [0], [1], [0, 0, 1, 1], [], []>} : vector<16x64xf32>, vector<64x128xf32>, vector<16x128xf32> -> vector<16x128xf32>
      %c0_80 = arith.constant 0 : index
      %c0_81 = arith.constant 0 : index
      %382 = vector.load %arg7[%c0_80, %c0_81] : memref<1x128xf32, #tpu.memory_space<vmem>>, vector<1x128xf32>
      %383 = vector.broadcast %382 : vector<1x128xf32> to vector<16x128xf32>
      %384 = arith.addf %381, %383 : vector<16x128xf32>
      %c0_82 = arith.constant 0 : index
      %c0_83 = arith.constant 0 : index
      %385 = vector.load %arg8[%c0_82, %c0_83] : memref<16x128xf32, #tpu.memory_space<vmem>>, vector<16x128xf32>
      tpu.vector_store %arg8[%c0_82, %c0_83], %384 {strides = array<i32>} : memref<16x128xf32, #tpu.memory_space<vmem>>, vector<16x128xf32>,
    } else {
    }
    return
  }
  func.func @transform_0(%arg0: i32, %arg1: i32) -> (i32, i32, i32) {
    %c0_i32 = arith.constant 0 : i32
    %c0_i32_0 = arith.constant 0 : i32
    return %arg1, %arg0, %c0_i32 : i32, i32, i32
  }
  func.func @transform_1(%arg0: i32, %arg1: i32) -> (i32, i32) {
    %c0_i32 = arith.constant 0 : i32
    %c0_i32_0 = arith.constant 0 : i32
    return %arg0, %c0_i32 : i32, i32
  }
  func.func @transform_2(%arg0: i32, %arg1: i32) -> (i32, i32) {
    %c0_i32 = arith.constant 0 : i32
    %c0_i32_0 = arith.constant 0 : i32
    %c0_i32_1 = arith.constant 0 : i32
    return %c0_i32, %c0_i32_0 : i32, i32
  }
  func.func @transform_3(%arg0: i32, %arg1: i32) -> (i32, i32) {
    %c0_i32 = arith.constant 0 : i32
    %c0_i32_0 = arith.constant 0 : i32
    %c0_i32_1 = arith.constant 0 : i32
    return %c0_i32, %c0_i32_0 : i32, i32
  }
  func.func @transform_4(%arg0: i32, %arg1: i32) -> (i32, i32) {
    %c0_i32 = arith.constant 0 : i32
    %c0_i32_0 = arith.constant 0 : i32
    %c0_i32_1 = arith.constant 0 : i32
    return %c0_i32, %c0_i32_0 : i32, i32
  }
  func.func @transform_5(%arg0: i32, %arg1: i32) -> (i32, i32) {
    %c0_i32 = arith.constant 0 : i32
    %c0_i32_0 = arith.constant 0 : i32
    %c0_i32_1 = arith.constant 0 : i32
    return %c0_i32, %c0_i32_0 : i32, i32
  }
  func.func @transform_6(%arg0: i32, %arg1: i32) -> (i32, i32) {
    %c0_i32 = arith.constant 0 : i32
    %c0_i32_0 = arith.constant 0 : i32
    return %arg0, %c0_i32 : i32, i32
  }
}

</mosaic_0001>

<bundles_post_ra>
// kernel: reverse.2
= control target key start
LH: loop header
LB: loop body
LE: loop exit
PB: predicated region body
PF: predicated region fallthrough
CT: control target
= control target key end

     0   :  { %s104_s0 = inlined_call_operand.vmem [shape: f32[8,4,32], index: 0, kind: input, shape index: {}]   ;;  %s105_s1 = inlined_call_operand.vmem [shape: f32[8,4,32], index: 1, kind: output, shape index: {}]  }
   0x1   :  { %v32_v0 = vld [vmem:[%s104_s0 + $0x1c] sm:$0xf]  ;;  %v33_v1 = vld [vmem:[%s104_s0 + $0x18] sm:$0xf]  ;;  %v35_v2 = vld [vmem:[%s104_s0 + $0x14] sm:$0xf] }
   0x2   :  { %4 = vst [vmem:[%s105_s1] sm:$0xf] %v32_v0  ;;  %34 = vst [vmem:[%s105_s1 + $0x4] sm:$0xf] %v33_v1  ;;  %v37_v3 = vld [vmem:[%s104_s0 + $0x10] sm:$0xf] }
   0x3   :  { %36 = vst [vmem:[%s105_s1 + $0x8] sm:$0xf] %v35_v2  ;;  %v39_v4 = vld [vmem:[%s104_s0 + $0xc] sm:$0xf]  ;;  %v41_v5 = vld [vmem:[%s104_s0 + $0x8] sm:$0xf] }
   0x4   :  { %38 = vst [vmem:[%s105_s1 + $0xc] sm:$0xf] %v37_v3  ;;  %40 = vst [vmem:[%s105_s1 + $0x10] sm:$0xf] %v39_v4  ;;  %v43_v6 = vld [vmem:[%s104_s0 + $0x4] sm:$0xf] }
   0x5   :  { %42 = vst [vmem:[%s105_s1 + $0x14] sm:$0xf] %v41_v5  ;;  %v29_v7 = vld [vmem:[%s104_s0] sm:$0xf]  ;;  %44 = vst [vmem:[%s105_s1 + $0x18] sm:$0xf] %v43_v6 }
   0x6   :  { %45 = vst [vmem:[%s105_s1 + $0x1c] sm:$0xf] %v29_v7 }

// kernel: rnn_classifier_forward.1
= control target key start
LH: loop header
LB: loop body
LE: loop exit
PB: predicated region body
PF: predicated region fallthrough
CT: control target
= control target key end

     0   :  { %vm27_vm0 = vcmask 523264   ;;  %v2142_v3 = vmov 0.0   ;;  %v2143_v27 = vmov 0   ;;  %s2144_s18 = smov 64   ;;  %s2775_s2 = inlined_call_operand.vmem [shape: f32[64,192], index: 2, kind: input, shape index: {}]   ;;  %s2776_s0 = inlined_call_operand.vmem [shape: f32[8,16,192], index: 0, kind: input, shape index: {}]   ;;  %s2777_s3 = inlined_call_operand.vmem [shape: f32[1,64], index: 3, kind: input, shape index: {}]   ;;  %s2778_s1 = inlined_call_operand.vmem [shape: s32[16,1], index: 1, kind: input, shape index: {}]   ;;  %s2779_s4 = inlined_call_operand.vmem [shape: f32[64,128], index: 4, kind: input, shape index: {}]   ;;  %s2780_s5 = inlined_call_operand.vmem [shape: f32[1,128], index: 5, kind: input, shape index: {}]   ;;  %s2781_s6 = inlined_call_operand.vmem [shape: f32[16,128], index: 6, kind: output, shape index: {}]  }
   0x1   :  { %v31_v0 = vld [vmem:[%s2775_s2 + $0x8] sm:$0xff]  ;;  %v33_v1 = vld [vmem:[%s2775_s2 + $0x18] sm:$0xff]  ;;  %v30_v2 = vld [vmem:[%s2775_s2] sm:$0xff]  ;;  %135 = vmatprep.mubr.f32.mxu0 %v2142_v3  ;;  %28 = vst.msk [vmem:[#allocation2] sm:$0xff] %vm27_vm0, %v2142_v3  ;;  %324 = vmatprep.mubr.f32.mxu1 %v2142_v3 }
   0x2   :  { %29 = vst.msk [vmem:[#allocation2 + $0x8] sm:$0xff] %vm27_vm0, %v2142_v3  ;;  %v2195_v4 = vpack.c.bf16 %v33_v1, %v31_v0  ;;  %v32_v5 = vld [vmem:[%s2775_s2 + $0x10] sm:$0xff]  ;;  %v35_v6 = vld [vmem:[%s2775_s2 + $0x28] sm:$0xff]  ;;  %v37_v7 = vld [vmem:[%s2775_s2 + $0x38] sm:$0xff]  ;;  %1963 = vset.pattern.permute.xlu0 %v2143_v27  ;;  %1969 = vset.pattern.permute.xlu1 %v2143_v27 }
   0x3   :  { %v2206_v8 = vpack.c.bf16 %v32_v5, %v30_v2  ;;  %v2208_v9 = vpack.c.bf16 %v37_v7, %v35_v6  ;;  %v34_v10 = vld [vmem:[%s2775_s2 + $0x20] sm:$0xff]  ;;  %v36_v11 = vld [vmem:[%s2775_s2 + $0x30] sm:$0xff]  ;;  %v39_v12 = vld [vmem:[%s2775_s2 + $0x48] sm:$0xff] }
   0x4   :  { %1817 = vmatprep.subr.bf16.mxu0 %v2195_v4  ;;  %v41_v13 = vld [vmem:[%s2775_s2 + $0x58] sm:$0xff]  ;;  %1833 = vmatprep.subr.bf16.mxu1 %v2195_v4  ;;  %v2225_v14 = vpack.c.bf16 %v36_v11, %v34_v10  ;;  %v38_v16 = vld [vmem:[%s2775_s2 + $0x40] sm:$0xff]  ;;  %v40_v17 = vld [vmem:[%s2775_s2 + $0x50] sm:$0xff] }
   0x5   :  { %1819 = vmatpush1.bf16.msra.mxu0 %v2206_v8  ;;  %1835 = vmatpush1.bf16.msra.mxu1 %v2206_v8  ;;  %v2229_v15 = vpack.c.bf16 %v41_v13, %v39_v12  ;;  %v43_v18 = vld [vmem:[%s2775_s2 + $0x68] sm:$0xff]  ;;  %v45_v19 = vld [vmem:[%s2775_s2 + $0x78] sm:$0xff]  ;;  %v2245_v20 = vpack.c.bf16 %v40_v17, %v38_v16  ;;  %v42_v22 = vld [vmem:[%s2775_s2 + $0x60] sm:$0xff]  ;;  %v55_v17 = vlaneseq }
   0x6   :  { %1821 = vmatprep.subr.bf16.mxu0 %v2208_v9  ;;  %1837 = vmatprep.subr.bf16.mxu1 %v2208_v9  ;;  %v2249_v21 = vpack.c.bf16 %v45_v19, %v43_v18  ;;  %v44_v23 = vld [vmem:[%s2775_s2 + $0x70] sm:$0xff]  ;;  %v148_v28 = vld [vmem:[%s2776_s0] sm:$0xff]  ;;  %v149_v45 = vld [vmem:[%s2776_s0 + $0x8] sm:$0xff] }
   0x7   :  { %v2259_v24 = vpack.c.bf16 %v44_v23, %v42_v22  ;;  %v150_v32 = vld [vmem:[%s2776_s0 + $0x10] sm:$0xff]  ;;  %v2295_v42 = vld [vmem:[%s2777_s3] ss:$0 sm:$0xff]  ;;  %v151_v50 = vld [vmem:[%s2776_s0 + $0x18] sm:$0xff]  ;;  %v56_v18 = vand.u32 127, %v55_v17 }
   0x8   :  { %v2265_v25 = vld [vmem:[#allocation2] sm:$0xff]  ;;  %v2315_v55 = vld [vmem:[%s2778_s1 + $0x8] sm:$0xff] }
   0x9   :  { %1823 = vmatpush1.bf16.msra.mxu0 %v2225_v14  ;;  %1839 = vmatpush1.bf16.msra.mxu1 %v2225_v14  ;;  %v2273_v26 = vld [vmem:[#allocation2 + $0x8] sm:$0xff]  ;;  %v2308_v53 = vld [vmem:[%s2778_s1] sm:$0xff]  ;;  %vm198_vm3 = vcmp.gt.s32.totalorder %v2315_v55, 0  ;;  %vm218_vm4 = vcmp.gt.s32.totalorder %v2315_v55, 7  ;;  %vm57_vm5 = vcmp.lt.s32.totalorder %v56_v18, 32  ;;  %vm388_vm6 = vcmp.gt.s32.totalorder %v2315_v55, 1 }
   0xa   :  { %1825 = vmatprep.subr.bf16.mxu0 %v2229_v15  ;;  %1841 = vmatprep.subr.bf16.mxu1 %v2229_v15  ;;  %vm197_vm1 = vcmp.gt.s32.totalorder %v2308_v53, 0  ;;  %vm217_vm2 = vcmp.gt.s32.totalorder %v2308_v53, 7  ;;  %v2332_v60 = vsel %vm198_vm3, 1.0, %v2142_v3  ;;  %v2335_v61 = vsel %vm218_vm4, 1.0, %v2142_v3 }
   0xb   :  { %v2319_v56 = vsel %vm197_vm1, 1.0, %v2142_v3  ;;  %v2322_v57 = vsel %vm217_vm2, 1.0, %v2142_v3  ;;  %v1970_v62 = vpack.i.bf16 %v2335_v61, %v2332_v60  ;;  %v2344_v19 = vsel %vm57_vm5, 1.0, %v2142_v3 }
   0xc   :  { %v1964_v59 = vpack.i.bf16 %v2322_v57, %v2319_v56  ;;  %v2347_v23 = vsub.f32 1.0, %v2344_v19  ;;  %vm408_vm7 = vcmp.gt.s32.totalorder %v2315_v55, 6  ;;  %vm387_vm8 = vcmp.gt.s32.totalorder %v2308_v53, 1 }
   0xd   :  { %1827 = vmatpush1.bf16.msra.mxu0 %v2245_v20  ;;  %1843 = vmatpush1.bf16.msra.mxu1 %v2245_v20  ;;  %vm407_vm9 = vcmp.gt.s32.totalorder %v2308_v53, 6  ;;  %vm578_vm10 = vcmp.gt.s32.totalorder %v2315_v55, 2  ;;  %vm598_vm11 = vcmp.gt.s32.totalorder %v2315_v55, 5  ;;  %vm577_vm12 = vcmp.gt.s32.totalorder %v2308_v53, 2 }
   0xe   :  { %1829 = vmatprep.subr.bf16.mxu0 %v2249_v21  ;;  %1845 = vmatprep.subr.bf16.mxu1 %v2249_v21  ;;  %vm597_vm13 = vcmp.gt.s32.totalorder %v2308_v53, 5  ;;  %vm768_vm14 = vcmp.gt.s32.totalorder %v2315_v55, 3  ;;  %vm788_vm15 = vcmp.gt.s32.totalorder %v2315_v55, 4  ;;  %vm767_vm1 = vcmp.gt.s32.totalorder %v2308_v53, 3 }
   0xf   :  { %vm787_vm2 = vcmp.gt.s32.totalorder %v2308_v53, 4 }
  0x11   :  { %1831 = vmatpush1.bf16.msra.mxu0 %v2259_v24  ;;  %1847 = vmatpush1.bf16.msra.mxu1 %v2259_v24 }
  0x12   :  { %1849 = vmatprep.subr.bf16.mxu0 %v2195_v4  ;;  %1865 = vmatprep.subr.bf16.mxu1 %v2195_v4 }
  0x14   :  { %1692 = vmatmul.mubr.msk.f32.vlgmr.msra.gmra.mrb[0].mxu0 %vm27_vm0, %v2265_v25 }
  0x15   :  { %141 = vmatprep.mubr.f32.mxu0 %v2142_v3  ;;  %1851 = vmatpush1.bf16.msra.mxu0 %v2206_v8 }
  0x16   :  { %1853 = vmatprep.subr.bf16.mxu0 %v2208_v9 }
  0x18   :  { %1693 = vmatmul.mubr.msk.f32.gmra.mrb[2].mxu0 %vm27_vm0, %v2273_v26 }
  0x19   :  { %1855 = vmatpush1.bf16.msra.mxu0 %v2225_v14  ;;  %514 = vmatprep.mubr.f32.mxu0 %v2142_v3 }
  0x1a   :  { %1857 = vmatprep.subr.bf16.mxu0 %v2229_v15 }
  0x1d   :  { %1859 = vmatpush1.bf16.msra.mxu0 %v2245_v20 }
  0x1e   :  { %1861 = vmatprep.subr.bf16.mxu0 %v2249_v21 }
  0x21   :  { %1863 = vmatpush1.bf16.msra.mxu0 %v2259_v24 }
  0x22   :  { %1881 = vmatprep.subr.bf16.mxu0 %v2195_v4 }
  0xe7   :  { %v137_v29 = vpop.f32.mrb[0].mxu0 }
  0xe8   :  { %v152_v30 = vadd.f32 %v148_v28, %v137_v29  ;;  %v139_v31 = vpop.f32.mrb[1].mxu0 }
  0xe9   :  { %v166_v43 = vadd.f32 %v2295_v42, %v139_v31 }
  0xea   :  { %v1694_v33 = vmul.f32 -1.442695, %v152_v30 }
  0xeb   :  { %v143_v34 = vpop.f32.mrb[2].mxu0 }
  0xec   :  { %2045 = vpow2.f32 %v1694_v33  ;;  %v153_v35 = vadd.f32 %v150_v32, %v143_v34  ;;  %v145_v36 = vpop.f32.mrb[3].mxu0 }
  0xed   :  { %v167_v48 = vadd.f32 %v2295_v42, %v145_v36 }
  0xee   :  { %v1695_v37 = vmul.f32 -1.442695, %v153_v35 }
  0xf0   :  { %2047 = vpow2.f32 %v1695_v37 }
  0xf6   :  { %v2046_v38 = vpop.eup %2045 }
  0xf7   :  { %v160_v39 = vadd.f32 1.0, %v2046_v38 }
  0xf9   :  { %2049 = vrcp.f32 %v160_v39 }
  0xfa   :  { %v2048_v40 = vpop.eup %2047 }
  0xfb   :  { %v161_v41 = vadd.f32 1.0, %v2048_v40 }
  0xfd   :  { %2051 = vrcp.f32 %v161_v41 }
 0x103   :  { %v2050_v44 = vpop.eup %2049 }
 0x104   :  { %v168_v46 = vmul.f32 %v2050_v44, %v166_v43  ;;  %v174_v0 = vsub.f32 1.0, %v2050_v44 }
 0x106   :  { %v170_v47 = vadd.f32 %v168_v46, %v149_v45 }
 0x107   :  { %v2052_v49 = vpop.eup %2051 }
 0x108   :  { %2053 = vtanh.f32 %v170_v47  ;;  %v169_v51 = vmul.f32 %v2052_v49, %v167_v48  ;;  %v175_v7 = vsub.f32 1.0, %v2052_v49  ;;  %v2368_v48 = vsel %vm408_vm7, 1.0, %v2142_v3 }
 0x10a   :  { %v171_v52 = vadd.f32 %v169_v51, %v151_v50  ;;  %v1702_v50 = vld [vmem:[%s2776_s0 + $0x20] sm:$0xff] }
 0x10c   :  { %2055 = vtanh.f32 %v171_v52 }
 0x112   :  { %v2054_v54 = vpop.eup %2053 }
 0x113   :  { %178 = vrot.lane.b32.xlu0 %v2054_v54, %s2144_s18 }
 0x116   :  { %v2056_v58 = vpop.eup %2055 }
 0x117   :  { %180 = vrot.lane.b32.xlu1 %v2056_v58, %s2144_s18  ;;  %186 = vrot.lane.b32.xlu0 %v2265_v25, %s2144_s18  ;;  %v1704_v58 = vld [vmem:[%s2776_s0 + $0x30] sm:$0xff] }
 0x11b   :  { %188 = vrot.lane.b32.xlu1 %v2273_v26, %s2144_s18  ;;  %1965 = vperm.xlu0 %1963, %v1964_v59  }
 0x11f   :  { %1971 = vperm.xlu1 %1969, %v1970_v62  }
 0x185   :  { %v179_v63 = vpop.permute.xlu0 %178 }
 0x186   :  { %v184_v5 = vmul.f32 %v179_v63, %v174_v0 }
 0x189   :  { %v181_v1 = vpop.permute.xlu1 %180  ;;  %v187_v2 = vpop.permute.xlu0 %186 }
 0x18a   :  { %v192_v6 = vmul.f32 %v2050_v44, %v187_v2  ;;  %v185_v12 = vmul.f32 %v181_v1, %v175_v7 }
 0x18c   :  { %v194_v10 = vadd.f32 %v192_v6, %v184_v5 }
 0x18d   :  { %v189_v11 = vpop.permute.xlu1 %188 }
 0x18e   :  { %v193_v13 = vmul.f32 %v2052_v49, %v189_v11  ;;  %239 = vrot.lane.b32.xlu1 %v194_v10, %s2144_s18 }
 0x190   :  { %v195_v16 = vadd.f32 %v193_v13, %v185_v12  ;;  %v1703_v12 = vld [vmem:[%s2776_s0 + $0x28] sm:$0xff] }
 0x192   :  { %241 = vrot.lane.b32.xlu0 %v195_v16, %s2144_s18 }
 0x19a   :  { %v1966_v22 = vpop.permute.xlu0 %1965 }
 0x19b   :  { %v1968_v27 = vunpack.i.h.bf16 %v1966_v22  ;;  %v1967_v28 = vunpack.i.l.bf16 %v1966_v22  ;;  %v1705_v22 = vld [vmem:[%s2776_s0 + $0x38] sm:$0xff] }
 0x19d   :  { %v233_v30 = vmul.f32 %v1968_v27, %v2347_v23  ;;  %v213_v31 = vmul.f32 %v1967_v28, %v2344_v19 }
 0x19e   :  { %v1972_v29 = vpop.permute.xlu1 %1971 }
 0x19f   :  { %v1974_v32 = vunpack.i.h.bf16 %v1972_v29  ;;  %v1973_v33 = vunpack.i.l.bf16 %v1972_v29  ;;  %v235_v36 = vadd.f32 %v233_v30, %v213_v31  ;;  %v2405_v30 = vsel %vm387_vm8, 1.0, %v2142_v3 }
 0x1a0   :  { %v2408_v31 = vsel %vm407_vm9, 1.0, %v2142_v3 }
 0x1a1   :  { %v234_v34 = vmul.f32 %v1974_v32, %v2347_v23  ;;  %v214_v35 = vmul.f32 %v1973_v33, %v2344_v19  ;;  %v247_v37 = vsub.f32 1.0, %v235_v36  ;;  %v1975_v33 = vpack.i.bf16 %v2408_v31, %v2405_v30 }
 0x1a3   :  { %v236_v38 = vadd.f32 %v234_v34, %v214_v35  ;;  %v249_v39 = vmul.f32 %v247_v37, %v2265_v25  ;;  %v2365_v25 = vsel %vm388_vm6, 1.0, %v2142_v3 }
 0x1a4   :  { %v1980_v49 = vpack.i.bf16 %v2368_v48, %v2365_v25 }
 0x1a5   :  { %v248_v40 = vsub.f32 1.0, %v236_v38 }
 0x1a7   :  { %v250_v45 = vmul.f32 %v248_v40, %v2273_v26 }
 0x200   :  { %v240_v41 = vpop.permute.xlu1 %239 }
 0x201   :  { %v245_v43 = vmul.f32 %v240_v41, %v235_v36 }
 0x203   :  { %v2354_v44 = vadd.f32 %v249_v39, %v245_v43 }
 0x204   :  { %v242_v46 = vpop.permute.xlu0 %241 }
 0x205   :  { %v246_v47 = vmul.f32 %v242_v46, %v236_v38  ;;  %376 = vrot.lane.b32.xlu0 %v2354_v44, %s2144_s18  ;;  %1700 = vmatmul.mubr.msk.f32.vlgmr.msra.gmra.mrb[0].mxu1 %vm27_vm0, %v2354_v44 }
 0x206   :  { %330 = vmatprep.mubr.f32.mxu1 %v2142_v3  ;;  %1867 = vmatpush1.bf16.msra.mxu1 %v2206_v8 }
 0x207   :  { %v2371_v26 = vadd.f32 %v250_v45, %v246_v47  ;;  %1869 = vmatprep.subr.bf16.mxu1 %v2208_v9 }
 0x209   :  { %378 = vrot.lane.b32.xlu0 %v2371_v26, %s2144_s18  ;;  %1701 = vmatmul.mubr.msk.f32.gmra.mrb[2].mxu1 %vm27_vm0, %v2371_v26 }
 0x20a   :  { %1871 = vmatpush1.bf16.msra.mxu1 %v2225_v14  ;;  %704 = vmatprep.mubr.f32.mxu1 %v2142_v3 }
 0x20b   :  { %1873 = vmatprep.subr.bf16.mxu1 %v2229_v15 }
 0x20d   :  { %1981 = vperm.xlu0 %1963, %v1980_v49  }
 0x20e   :  { %1875 = vmatpush1.bf16.msra.mxu1 %v2245_v20 }
 0x20f   :  { %1877 = vmatprep.subr.bf16.mxu1 %v2249_v21 }
 0x212   :  { %1879 = vmatpush1.bf16.msra.mxu1 %v2259_v24 }
 0x213   :  { %1897 = vmatprep.subr.bf16.mxu1 %v2195_v4 }
 0x277   :  { %v377_v34 = vpop.permute.xlu0 %376 }
 0x27b   :  { %v379_v41 = vpop.permute.xlu0 %378 }
 0x2d8   :  { %v326_v51 = vpop.f32.mrb[0].mxu1 }
 0x2d9   :  { %v342_v52 = vadd.f32 %v1702_v50, %v326_v51  ;;  %v328_v54 = vpop.f32.mrb[1].mxu1 }
 0x2da   :  { %v356_v10 = vadd.f32 %v2295_v42, %v328_v54 }
 0x2db   :  { %v1706_v59 = vmul.f32 -1.442695, %v342_v52  ;;  %v1982_v52 = vpop.permute.xlu0 %1981 }
 0x2dc   :  { %v332_v62 = vpop.f32.mrb[2].mxu1  ;;  %v1984_v54 = vunpack.i.h.bf16 %v1982_v52 }
 0x2dd   :  { %2057 = vpow2.f32 %v1706_v59  ;;  %v343_v63 = vadd.f32 %v1704_v58, %v332_v62  ;;  %v334_v0 = vpop.f32.mrb[3].mxu1  ;;  %v1983_v58 = vunpack.i.l.bf16 %v1982_v52 }
 0x2de   :  { %v357_v17 = vadd.f32 %v2295_v42, %v334_v0 }
 0x2df   :  { %v1707_v1 = vmul.f32 -1.442695, %v343_v63  ;;  %v424_v63 = vmul.f32 %v1984_v54, %v2347_v23  ;;  %v404_v0 = vmul.f32 %v1983_v58, %v2344_v19  ;;  %v1717_v54 = vld [vmem:[%s2776_s0 + $0x58] sm:$0xff] }
 0x2e1   :  { %2059 = vpow2.f32 %v1707_v1 }
 0x2e7   :  { %v2058_v2 = vpop.eup %2057 }
 0x2e8   :  { %v350_v5 = vadd.f32 1.0, %v2058_v2 }
 0x2ea   :  { %2061 = vrcp.f32 %v350_v5  ;;  %v426_v5 = vadd.f32 %v424_v63, %v404_v0  ;;  %v2471_v63 = vsel %vm577_vm12, 1.0, %v2142_v3  ;;  %v2474_v0 = vsel %vm597_vm13, 1.0, %v2142_v3 }
 0x2eb   :  { %v2060_v6 = vpop.eup %2059 }
 0x2ec   :  { %v351_v7 = vadd.f32 1.0, %v2060_v6 }
 0x2ee   :  { %2063 = vrcp.f32 %v351_v7 }
 0x2f4   :  { %v2062_v11 = vpop.eup %2061 }
 0x2f5   :  { %v358_v13 = vmul.f32 %v2062_v11, %v356_v10  ;;  %v364_v35 = vsub.f32 1.0, %v2062_v11  ;;  %v382_v37 = vmul.f32 %v2062_v11, %v377_v34  ;;  %v438_v11 = vsub.f32 1.0, %v426_v5 }
 0x2f7   :  { %v360_v16 = vadd.f32 %v1703_v12, %v358_v13 }
 0x2f8   :  { %v2064_v18 = vpop.eup %2063 }
 0x2f9   :  { %2065 = vtanh.f32 %v360_v16  ;;  %v359_v27 = vmul.f32 %v2064_v18, %v357_v17  ;;  %v365_v40 = vsub.f32 1.0, %v2064_v18  ;;  %v383_v45 = vmul.f32 %v2064_v18, %v379_v41 }
 0x2fa   :  { %v440_v16 = vmul.f32 %v438_v11, %v2371_v26  ;;  %v2434_v18 = vsel %vm598_vm11, 1.0, %v2142_v3 }
 0x2fb   :  { %v361_v28 = vadd.f32 %v1705_v22, %v359_v27  ;;  %v1714_v27 = vld [vmem:[%s2776_s0 + $0x40] sm:$0xff] }
 0x2fd   :  { %2067 = vtanh.f32 %v361_v28 }
 0x303   :  { %v2066_v29 = vpop.eup %2065 }
 0x304   :  { %368 = vrot.lane.b32.xlu1 %v2066_v29, %s2144_s18 }
 0x307   :  { %v2068_v32 = vpop.eup %2067 }
 0x308   :  { %370 = vrot.lane.b32.xlu1 %v2068_v32, %s2144_s18 }
 0x30c   :  { %1976 = vperm.xlu1 %1969, %v1975_v33   ;;  %v1716_v33 = vld [vmem:[%s2776_s0 + $0x50] sm:$0xff] }
 0x376   :  { %v369_v36 = vpop.permute.xlu1 %368 }
 0x377   :  { %v374_v38 = vmul.f32 %v369_v36, %v364_v35 }
 0x379   :  { %v384_v39 = vadd.f32 %v382_v37, %v374_v38 }
 0x37a   :  { %v371_v43 = vpop.permute.xlu1 %370 }
 0x37b   :  { %v375_v46 = vmul.f32 %v371_v43, %v365_v40  ;;  %429 = vrot.lane.b32.xlu1 %v384_v39, %s2144_s18 }
 0x37d   :  { %v385_v47 = vadd.f32 %v383_v45, %v375_v46 }
 0x37f   :  { %431 = vrot.lane.b32.xlu0 %v385_v47, %s2144_s18  ;;  %v1715_v47 = vld [vmem:[%s2776_s0 + $0x48] sm:$0xff] }
 0x38b   :  { %v1977_v49 = vpop.permute.xlu1 %1976 }
 0x38c   :  { %v1979_v50 = vunpack.i.h.bf16 %v1977_v49  ;;  %v1978_v51 = vunpack.i.l.bf16 %v1977_v49 }
 0x38e   :  { %v423_v59 = vmul.f32 %v1979_v50, %v2347_v23  ;;  %v403_v62 = vmul.f32 %v1978_v51, %v2344_v19 }
 0x390   :  { %v425_v1 = vadd.f32 %v423_v59, %v403_v62 }
 0x392   :  { %v437_v2 = vsub.f32 1.0, %v425_v1 }
 0x394   :  { %v439_v10 = vmul.f32 %v437_v2, %v2354_v44  ;;  %v2431_v44 = vsel %vm578_vm10, 1.0, %v2142_v3  ;;  %v1985_v2 = vpack.i.bf16 %v2474_v0, %v2471_v63 }
 0x395   :  { %v1990_v26 = vpack.i.bf16 %v2434_v18, %v2431_v44 }
 0x3ed   :  { %v430_v6 = vpop.permute.xlu1 %429 }
 0x3ee   :  { %v435_v7 = vmul.f32 %v430_v6, %v425_v1 }
 0x3f0   :  { %v2420_v12 = vadd.f32 %v439_v10, %v435_v7 }
 0x3f1   :  { %v432_v13 = vpop.permute.xlu0 %431 }
 0x3f2   :  { %v436_v17 = vmul.f32 %v432_v13, %v426_v5  ;;  %566 = vrot.lane.b32.xlu0 %v2420_v12, %s2144_s18  ;;  %1712 = vmatmul.mubr.msk.f32.vlgmr.msra.gmra.mrb[4].mxu0 %vm27_vm0, %v2420_v12 }
 0x3f3   :  { %520 = vmatprep.mubr.f32.mxu0 %v2142_v3  ;;  %1883 = vmatpush1.bf16.msra.mxu0 %v2206_v8 }
 0x3f4   :  { %v2437_v22 = vadd.f32 %v440_v16, %v436_v17  ;;  %1885 = vmatprep.subr.bf16.mxu0 %v2208_v9 }
 0x3f6   :  { %568 = vrot.lane.b32.xlu0 %v2437_v22, %s2144_s18  ;;  %1713 = vmatmul.mubr.msk.f32.gmra.mrb[6].mxu0 %vm27_vm0, %v2437_v22 }
 0x3f7   :  { %1887 = vmatpush1.bf16.msra.mxu0 %v2225_v14  ;;  %894 = vmatprep.mubr.f32.mxu0 %v2142_v3 }
 0x3f8   :  { %1889 = vmatprep.subr.bf16.mxu0 %v2229_v15 }
 0x3fa   :  { %1991 = vperm.xlu0 %1963, %v1990_v26  }
 0x3fb   :  { %1891 = vmatpush1.bf16.msra.mxu0 %v2245_v20 }
 0x3fc   :  { %1893 = vmatprep.subr.bf16.mxu0 %v2249_v21 }
 0x3ff   :  { %1895 = vmatpush1.bf16.msra.mxu0 %v2259_v24 }
 0x400   :  { %1913 = vmatprep.subr.bf16.mxu0 %v2195_v4 }
 0x464   :  { %v567_v5 = vpop.permute.xlu0 %566 }
 0x468   :  { %v569_v17 = vpop.permute.xlu0 %568 }
 0x4c5   :  { %v516_v28 = vpop.f32.mrb[4].mxu0 }
 0x4c6   :  { %v532_v29 = vadd.f32 %v1714_v27, %v516_v28  ;;  %v518_v32 = vpop.f32.mrb[5].mxu0 }
 0x4c7   :  { %v546_v45 = vadd.f32 %v2295_v42, %v518_v32 }
 0x4c8   :  { %v1718_v34 = vmul.f32 -1.442695, %v532_v29 }
 0x4c9   :  { %v522_v35 = vpop.f32.mrb[6].mxu0 }
 0x4ca   :  { %2069 = vpow2.f32 %v1718_v34  ;;  %v533_v36 = vadd.f32 %v1716_v33, %v522_v35  ;;  %v524_v37 = vpop.f32.mrb[7].mxu0  ;;  %v1992_v35 = vpop.permute.xlu0 %1991 }
 0x4cb   :  { %v547_v51 = vadd.f32 %v2295_v42, %v524_v37  ;;  %v1993_v37 = vunpack.i.l.bf16 %v1992_v35 }
 0x4cc   :  { %v1719_v38 = vmul.f32 -1.442695, %v533_v36  ;;  %v1994_v36 = vunpack.i.h.bf16 %v1992_v35 }
 0x4ce   :  { %2071 = vpow2.f32 %v1719_v38 }
 0x4d4   :  { %v2070_v39 = vpop.eup %2069 }
 0x4d5   :  { %v540_v40 = vadd.f32 1.0, %v2070_v39 }
 0x4d7   :  { %2073 = vrcp.f32 %v540_v40  ;;  %v614_v40 = vmul.f32 %v1994_v36, %v2347_v23 }
 0x4d8   :  { %v2072_v41 = vpop.eup %2071 }
 0x4d9   :  { %v541_v43 = vadd.f32 1.0, %v2072_v41  ;;  %v594_v41 = vmul.f32 %v1993_v37, %v2344_v19 }
 0x4db   :  { %2075 = vrcp.f32 %v541_v43 }
 0x4e1   :  { %v2074_v46 = vpop.eup %2073 }
 0x4e2   :  { %v548_v49 = vmul.f32 %v2074_v46, %v546_v45  ;;  %v554_v6 = vsub.f32 1.0, %v2074_v46  ;;  %v572_v10 = vmul.f32 %v2074_v46, %v567_v5  ;;  %v616_v46 = vadd.f32 %v614_v40, %v594_v41 }
 0x4e4   :  { %v550_v50 = vadd.f32 %v1715_v47, %v548_v49 }
 0x4e5   :  { %v2076_v52 = vpop.eup %2075 }
 0x4e6   :  { %2077 = vtanh.f32 %v550_v50  ;;  %v549_v58 = vmul.f32 %v2076_v52, %v547_v51  ;;  %v555_v16 = vsub.f32 1.0, %v2076_v52  ;;  %v573_v27 = vmul.f32 %v2076_v52, %v569_v17 }
 0x4e7   :  { %v628_v51 = vsub.f32 1.0, %v616_v46 }
 0x4e8   :  { %v551_v59 = vadd.f32 %v1717_v54, %v549_v58 }
 0x4e9   :  { %v630_v58 = vmul.f32 %v628_v51, %v2437_v22 }
 0x4ea   :  { %2079 = vtanh.f32 %v551_v59 }
 0x4f0   :  { %v2078_v62 = vpop.eup %2077 }
 0x4f1   :  { %558 = vrot.lane.b32.xlu1 %v2078_v62, %s2144_s18  ;;  %v2500_v62 = vsel %vm788_vm15, 1.0, %v2142_v3 }
 0x4f4   :  { %v2080_v1 = vpop.eup %2079 }
 0x4f5   :  { %560 = vrot.lane.b32.xlu1 %v2080_v1, %s2144_s18  ;;  %v1726_v1 = vld [vmem:[%s2776_s0 + $0x60] sm:$0xff] }
 0x4f9   :  { %1986 = vperm.xlu1 %1969, %v1985_v2  }
 0x563   :  { %v559_v7 = vpop.permute.xlu1 %558 }
 0x564   :  { %v564_v11 = vmul.f32 %v559_v7, %v554_v6  ;;  %v1728_v7 = vld [vmem:[%s2776_s0 + $0x70] sm:$0xff] }
 0x566   :  { %v574_v13 = vadd.f32 %v572_v10, %v564_v11 }
 0x567   :  { %v561_v26 = vpop.permute.xlu1 %560 }
 0x568   :  { %v565_v28 = vmul.f32 %v561_v26, %v555_v16  ;;  %619 = vrot.lane.b32.xlu1 %v574_v13, %s2144_s18 }
 0x56a   :  { %v575_v29 = vadd.f32 %v573_v27, %v565_v28 }
 0x56c   :  { %621 = vrot.lane.b32.xlu0 %v575_v29, %s2144_s18 }
 0x578   :  { %v1987_v32 = vpop.permute.xlu1 %1986 }
 0x579   :  { %v1989_v33 = vunpack.i.h.bf16 %v1987_v32  ;;  %v1988_v34 = vunpack.i.l.bf16 %v1987_v32 }
 0x57b   :  { %v613_v38 = vmul.f32 %v1989_v33, %v2347_v23  ;;  %v593_v39 = vmul.f32 %v1988_v34, %v2344_v19  ;;  %v1727_v33 = vld [vmem:[%s2776_s0 + $0x68] sm:$0xff] }
 0x57d   :  { %v615_v43 = vadd.f32 %v613_v38, %v593_v39  ;;  %v1729_v38 = vld [vmem:[%s2776_s0 + $0x78] sm:$0xff] }
 0x57f   :  { %v627_v45 = vsub.f32 1.0, %v615_v43 }
 0x581   :  { %v629_v50 = vmul.f32 %v627_v45, %v2420_v12  ;;  %v2497_v12 = vsel %vm768_vm14, 1.0, %v2142_v3  ;;  %v2540_v45 = vsel %vm787_vm2, 1.0, %v2142_v3 }
 0x582   :  { %v2000_v22 = vpack.i.bf16 %v2500_v62, %v2497_v12 }
 0x5da   :  { %v620_v47 = vpop.permute.xlu1 %619 }
 0x5db   :  { %v625_v49 = vmul.f32 %v620_v47, %v615_v43  ;;  %v2537_v43 = vsel %vm767_vm1, 1.0, %v2142_v3 }
 0x5dc   :  { %v1995_v47 = vpack.i.bf16 %v2540_v45, %v2537_v43 }
 0x5dd   :  { %v2486_v52 = vadd.f32 %v629_v50, %v625_v49 }
 0x5de   :  { %v622_v54 = vpop.permute.xlu0 %621 }
 0x5df   :  { %v626_v59 = vmul.f32 %v622_v54, %v616_v46  ;;  %756 = vrot.lane.b32.xlu0 %v2486_v52, %s2144_s18  ;;  %1724 = vmatmul.mubr.msk.f32.vlgmr.msra.gmra.mrb[4].mxu1 %vm27_vm0, %v2486_v52 }
 0x5e0   :  { %710 = vmatprep.mubr.f32.mxu1 %v2142_v3  ;;  %1899 = vmatpush1.bf16.msra.mxu1 %v2206_v8 }
 0x5e1   :  { %v2503_v55 = vadd.f32 %v630_v58, %v626_v59  ;;  %1901 = vmatprep.subr.bf16.mxu1 %v2208_v9 }
 0x5e3   :  { %758 = vrot.lane.b32.xlu0 %v2503_v55, %s2144_s18  ;;  %1725 = vmatmul.mubr.msk.f32.gmra.mrb[6].mxu1 %vm27_vm0, %v2503_v55 }
 0x5e4   :  { %1903 = vmatpush1.bf16.msra.mxu1 %v2225_v14  ;;  %1084 = vmatprep.mubr.f32.mxu1 %v2142_v3 }
 0x5e5   :  { %1905 = vmatprep.subr.bf16.mxu1 %v2229_v15 }
 0x5e7   :  { %2001 = vperm.xlu0 %1963, %v2000_v22  }
 0x5e8   :  { %1907 = vmatpush1.bf16.msra.mxu1 %v2245_v20 }
 0x5e9   :  { %1909 = vmatprep.subr.bf16.mxu1 %v2249_v21 }
 0x5ec   :  { %1911 = vmatpush1.bf16.msra.mxu1 %v2259_v24 }
 0x5ed   :  { %1929 = vmatprep.subr.bf16.mxu1 %v2195_v4 }
 0x651   :  { %v757_v49 = vpop.permute.xlu0 %756 }
 0x655   :  { %v759_v22 = vpop.permute.xlu0 %758 }
 0x6b2   :  { %v706_v2 = vpop.f32.mrb[4].mxu1 }
 0x6b3   :  { %v722_v5 = vadd.f32 %v1726_v1, %v706_v2  ;;  %v708_v6 = vpop.f32.mrb[5].mxu1 }
 0x6b4   :  { %v736_v29 = vadd.f32 %v2295_v42, %v708_v6 }
 0x6b5   :  { %v1730_v10 = vmul.f32 -1.442695, %v722_v5 }
 0x6b6   :  { %v712_v11 = vpop.f32.mrb[6].mxu1 }
 0x6b7   :  { %2081 = vpow2.f32 %v1730_v10  ;;  %v723_v13 = vadd.f32 %v1728_v7, %v712_v11  ;;  %v714_v16 = vpop.f32.mrb[7].mxu1 }
 0x6b8   :  { %v737_v36 = vadd.f32 %v2295_v42, %v714_v16 }
 0x6b9   :  { %v1731_v17 = vmul.f32 -1.442695, %v723_v13  ;;  %v2002_v13 = vpop.permute.xlu0 %2001 }
 0x6ba   :  { %v2004_v16 = vunpack.i.h.bf16 %v2002_v13 }
 0x6bb   :  { %2083 = vpow2.f32 %v1731_v17  ;;  %v2003_v17 = vunpack.i.l.bf16 %v2002_v13 }
 0x6c1   :  { %v2082_v26 = vpop.eup %2081 }
 0x6c2   :  { %v730_v4 = vadd.f32 1.0, %v2082_v26 }
 0x6c4   :  { %2085 = vrcp.f32 %v730_v4 }
 0x6c5   :  { %v2084_v27 = vpop.eup %2083 }
 0x6c6   :  { %v731_v28 = vadd.f32 1.0, %v2084_v27  ;;  %v804_v27 = vmul.f32 %v2004_v16, %v2347_v23 }
 0x6c8   :  { %2087 = vrcp.f32 %v731_v28  ;;  %v784_v28 = vmul.f32 %v2003_v17, %v2344_v19  ;;  %v1741_v17 = vld [vmem:[%s2776_s0 + $0x98] sm:$0xff] }
 0x6ce   :  { %v2086_v32 = vpop.eup %2085 }
 0x6cf   :  { %v738_v34 = vmul.f32 %v2086_v32, %v736_v29  ;;  %v744_v50 = vsub.f32 1.0, %v2086_v32  ;;  %v762_v53 = vmul.f32 %v2086_v32, %v757_v49 }
 0x6d1   :  { %v740_v35 = vadd.f32 %v1727_v33, %v738_v34  ;;  %v806_v33 = vadd.f32 %v804_v27, %v784_v28 }
 0x6d2   :  { %v2088_v37 = vpop.eup %2087 }
 0x6d3   :  { %2089 = vtanh.f32 %v740_v35  ;;  %v739_v39 = vmul.f32 %v2088_v37, %v737_v36  ;;  %v745_v59 = vsub.f32 1.0, %v2088_v37  ;;  %v763_v2 = vmul.f32 %v2088_v37, %v759_v22 }
 0x6d4   :  { %v818_v37 = vsub.f32 1.0, %v806_v33 }
 0x6d5   :  { %v741_v40 = vadd.f32 %v1729_v38, %v739_v39 }
 0x6d7   :  { %2091 = vtanh.f32 %v741_v40  ;;  %v820_v40 = vmul.f32 %v818_v37, %v2503_v55  ;;  %v1738_v55 = vld [vmem:[%s2776_s0 + $0x80] sm:$0xff] }
 0x6dd   :  { %v2090_v41 = vpop.eup %2089 }
 0x6de   :  { %748 = vrot.lane.b32.xlu1 %v2090_v41, %s2144_s18 }
 0x6e1   :  { %v2092_v46 = vpop.eup %2091 }
 0x6e2   :  { %750 = vrot.lane.b32.xlu1 %v2092_v46, %s2144_s18 }
 0x6e6   :  { %1996 = vperm.xlu1 %1969, %v1995_v47  }
 0x750   :  { %v749_v51 = vpop.permute.xlu1 %748 }
 0x751   :  { %v754_v54 = vmul.f32 %v749_v51, %v744_v50 }
 0x753   :  { %v764_v58 = vadd.f32 %v762_v53, %v754_v54 }
 0x754   :  { %v751_v1 = vpop.permute.xlu1 %750 }
 0x755   :  { %v755_v5 = vmul.f32 %v751_v1, %v745_v59  ;;  %809 = vrot.lane.b32.xlu1 %v764_v58, %s2144_s18 }
 0x757   :  { %v765_v6 = vadd.f32 %v763_v2, %v755_v5 }
 0x759   :  { %811 = vrot.lane.b32.xlu0 %v765_v6, %s2144_s18 }
 0x765   :  { %v1997_v7 = vpop.permute.xlu1 %1996 }
 0x766   :  { %v1999_v10 = vunpack.i.h.bf16 %v1997_v7  ;;  %v1998_v11 = vunpack.i.l.bf16 %v1997_v7  ;;  %v1739_v7 = vld [vmem:[%s2776_s0 + $0x88] sm:$0xff] }
 0x768   :  { %v803_v26 = vmul.f32 %v1999_v10, %v2347_v23  ;;  %v783_v4 = vmul.f32 %v1998_v11, %v2344_v19 }
 0x76a   :  { %v805_v29 = vadd.f32 %v803_v26, %v783_v4 }
 0x76c   :  { %v817_v32 = vsub.f32 1.0, %v805_v29 }
 0x76e   :  { %v819_v36 = vmul.f32 %v817_v32, %v2486_v52  ;;  %v2010_v52 = vpack.i.bf16 %v2497_v12, %v2500_v62  ;;  %v1740_v62 = vld [vmem:[%s2776_s0 + $0x90] sm:$0xff] }
 0x7c7   :  { %v810_v34 = vpop.permute.xlu1 %809 }
 0x7c8   :  { %v815_v35 = vmul.f32 %v810_v34, %v805_v29  ;;  %v2005_v29 = vpack.i.bf16 %v2537_v43, %v2540_v45 }
 0x7ca   :  { %v2552_v38 = vadd.f32 %v819_v36, %v815_v35 }
 0x7cb   :  { %v812_v39 = vpop.permute.xlu0 %811 }
 0x7cc   :  { %v816_v41 = vmul.f32 %v812_v39, %v806_v33  ;;  %946 = vrot.lane.b32.xlu0 %v2552_v38, %s2144_s18  ;;  %1736 = vmatmul.mubr.msk.f32.vlgmr.msra.gmra.mrb[8].mxu0 %vm27_vm0, %v2552_v38 }
 0x7cd   :  { %900 = vmatprep.mubr.f32.mxu0 %v2142_v3  ;;  %1915 = vmatpush1.bf16.msra.mxu0 %v2206_v8 }
 0x7ce   :  { %v2561_v46 = vadd.f32 %v820_v40, %v816_v41  ;;  %1917 = vmatprep.subr.bf16.mxu0 %v2208_v9 }
 0x7d0   :  { %948 = vrot.lane.b32.xlu0 %v2561_v46, %s2144_s18  ;;  %1737 = vmatmul.mubr.msk.f32.gmra.mrb[10].mxu0 %vm27_vm0, %v2561_v46 }
 0x7d1   :  { %1919 = vmatpush1.bf16.msra.mxu0 %v2225_v14  ;;  %1274 = vmatprep.mubr.f32.mxu0 %v2142_v3 }
 0x7d2   :  { %1921 = vmatprep.subr.bf16.mxu0 %v2229_v15 }
 0x7d4   :  { %2011 = vperm.xlu0 %1963, %v2010_v52  }
 0x7d5   :  { %1923 = vmatpush1.bf16.msra.mxu0 %v2245_v20 }
 0x7d6   :  { %1925 = vmatprep.subr.bf16.mxu0 %v2249_v21 }
 0x7d9   :  { %1927 = vmatpush1.bf16.msra.mxu0 %v2259_v24 }
 0x83e   :  { %v947_v32 = vpop.permute.xlu0 %946 }
 0x842   :  { %v949_v40 = vpop.permute.xlu0 %948 }
 0x853   :  { %v2012_v45 = vpop.permute.xlu0 %2011 }
 0x89f   :  { %v896_v47 = vpop.f32.mrb[8].mxu0 }
 0x8a0   :  { %v912_v49 = vadd.f32 %v1738_v55, %v896_v47  ;;  %v898_v12 = vpop.f32.mrb[9].mxu0 }
 0x8a1   :  { %v926_v5 = vadd.f32 %v2295_v42, %v898_v12 }
 0x8a2   :  { %v1742_v50 = vmul.f32 -1.442695, %v912_v49 }
 0x8a3   :  { %v902_v51 = vpop.f32.mrb[10].mxu0 }
 0x8a4   :  { %2093 = vpow2.f32 %v1742_v50  ;;  %v913_v53 = vadd.f32 %v1740_v62, %v902_v51  ;;  %v904_v54 = vpop.f32.mrb[11].mxu0  ;;  %v2014_v62 = vunpack.i.h.bf16 %v2012_v45  ;;  %v2013_v50 = vunpack.i.l.bf16 %v2012_v45 }
 0x8a5   :  { %v927_v13 = vadd.f32 %v2295_v42, %v904_v54 }
 0x8a6   :  { %v1743_v58 = vmul.f32 -1.442695, %v913_v53  ;;  %v994_v54 = vmul.f32 %v2014_v62, %v2347_v23 }
 0x8a8   :  { %2095 = vpow2.f32 %v1743_v58  ;;  %v974_v58 = vmul.f32 %v2013_v50, %v2344_v19 }
 0x8ae   :  { %v2094_v59 = vpop.eup %2093 }
 0x8af   :  { %v920_v22 = vadd.f32 1.0, %v2094_v59 }
 0x8b1   :  { %2097 = vrcp.f32 %v920_v22 }
 0x8b2   :  { %v2096_v1 = vpop.eup %2095 }
 0x8b3   :  { %v921_v2 = vadd.f32 1.0, %v2096_v1  ;;  %v996_v1 = vadd.f32 %v994_v54, %v974_v58 }
 0x8b5   :  { %2099 = vrcp.f32 %v921_v2 }
 0x8bb   :  { %v2098_v6 = vpop.eup %2097 }
 0x8bc   :  { %v928_v10 = vmul.f32 %v2098_v6, %v926_v5  ;;  %v934_v33 = vsub.f32 1.0, %v2098_v6  ;;  %v952_v35 = vmul.f32 %v2098_v6, %v947_v32 }
 0x8be   :  { %v930_v11 = vadd.f32 %v1739_v7, %v928_v10  ;;  %v1008_v7 = vsub.f32 1.0, %v996_v1 }
 0x8bf   :  { %v2100_v16 = vpop.eup %2099 }
 0x8c0   :  { %2101 = vtanh.f32 %v930_v11  ;;  %v929_v26 = vmul.f32 %v2100_v16, %v927_v13  ;;  %v935_v39 = vsub.f32 1.0, %v2100_v16  ;;  %v953_v52 = vmul.f32 %v2100_v16, %v949_v40 }
 0x8c1   :  { %v1010_v13 = vmul.f32 %v1008_v7, %v2561_v46 }
 0x8c2   :  { %v931_v4 = vadd.f32 %v1741_v17, %v929_v26 }
 0x8c4   :  { %2103 = vtanh.f32 %v931_v4 }
 0x8ca   :  { %v2102_v27 = vpop.eup %2101 }
 0x8cb   :  { %938 = vrot.lane.b32.xlu1 %v2102_v27, %s2144_s18 }
 0x8ce   :  { %v2104_v28 = vpop.eup %2103 }
 0x8cf   :  { %940 = vrot.lane.b32.xlu1 %v2104_v28, %s2144_s18 }
 0x8d3   :  { %2006 = vperm.xlu1 %1969, %v2005_v29  }
 0x93d   :  { %v939_v34 = vpop.permute.xlu1 %938 }
 0x93e   :  { %v944_v36 = vmul.f32 %v939_v34, %v934_v33  ;;  %v1751_v33 = vld [vmem:[%s2776_s0 + $0xa8] sm:$0xff] }
 0x940   :  { %v954_v37 = vadd.f32 %v952_v35, %v944_v36 }
 0x941   :  { %v941_v41 = vpop.permute.xlu1 %940 }
 0x942   :  { %v945_v55 = vmul.f32 %v941_v41, %v935_v39  ;;  %999 = vrot.lane.b32.xlu1 %v954_v37, %s2144_s18  ;;  %v1753_v39 = vld [vmem:[%s2776_s0 + $0xb8] sm:$0xff] }
 0x944   :  { %v955_v47 = vadd.f32 %v953_v52, %v945_v55 }
 0x946   :  { %1001 = vrot.lane.b32.xlu0 %v955_v47, %s2144_s18  ;;  %v2015_v47 = vpack.i.bf16 %v2471_v63, %v2474_v0 }
 0x952   :  { %v2007_v49 = vpop.permute.xlu1 %2006 }
 0x953   :  { %v2009_v12 = vunpack.i.h.bf16 %v2007_v49  ;;  %v2008_v43 = vunpack.i.l.bf16 %v2007_v49 }
 0x955   :  { %v993_v51 = vmul.f32 %v2009_v12, %v2347_v23  ;;  %v973_v53 = vmul.f32 %v2008_v43, %v2344_v19 }
 0x957   :  { %v995_v59 = vadd.f32 %v993_v51, %v973_v53 }
 0x959   :  { %v1007_v22 = vsub.f32 1.0, %v995_v59 }
 0x95b   :  { %v1009_v6 = vmul.f32 %v1007_v22, %v2552_v38  ;;  %v2020_v38 = vpack.i.bf16 %v2431_v44, %v2434_v18 }
 0x9b4   :  { %v1000_v2 = vpop.permute.xlu1 %999 }
 0x9b5   :  { %v1005_v5 = vmul.f32 %v1000_v2, %v995_v59 }
 0x9b7   :  { %v2601_v10 = vadd.f32 %v1009_v6, %v1005_v5 }
 0x9b8   :  { %v1002_v11 = vpop.permute.xlu0 %1001 }
 0x9b9   :  { %v1006_v16 = vmul.f32 %v1002_v11, %v996_v1  ;;  %1136 = vrot.lane.b32.xlu0 %v2601_v10, %s2144_s18  ;;  %1748 = vmatmul.mubr.msk.f32.vlgmr.msra.gmra.mrb[8].mxu1 %vm27_vm0, %v2601_v10 }
 0x9ba   :  { %1090 = vmatprep.mubr.f32.mxu1 %v2142_v3  ;;  %1931 = vmatpush1.bf16.msra.mxu1 %v2206_v8  ;;  %v1750_v8 = vld [vmem:[%s2776_s0 + $0xa0] sm:$0xff] }
 0x9bb   :  { %v2610_v17 = vadd.f32 %v1010_v13, %v1006_v16  ;;  %1933 = vmatprep.subr.bf16.mxu1 %v2208_v9 }
 0x9bd   :  { %1138 = vrot.lane.b32.xlu0 %v2610_v17, %s2144_s18  ;;  %1749 = vmatmul.mubr.msk.f32.gmra.mrb[10].mxu1 %vm27_vm0, %v2610_v17 }
 0x9be   :  { %1935 = vmatpush1.bf16.msra.mxu1 %v2225_v14  ;;  %1464 = vmatprep.mubr.f32.mxu1 %v2142_v3  ;;  %v1752_v14 = vld [vmem:[%s2776_s0 + $0xb0] sm:$0xff] }
 0x9bf   :  { %1937 = vmatprep.subr.bf16.mxu1 %v2229_v15 }
 0x9c1   :  { %2021 = vperm.xlu0 %1963, %v2020_v38  }
 0x9c2   :  { %1939 = vmatpush1.bf16.msra.mxu1 %v2245_v20 }
 0x9c3   :  { %1941 = vmatprep.subr.bf16.mxu1 %v2249_v21 }
 0x9c6   :  { %1943 = vmatpush1.bf16.msra.mxu1 %v2259_v24 }
 0xa8c   :  { %v1086_v9 = vpop.f32.mrb[8].mxu1 }
 0xa8d   :  { %v1102_v46 = vadd.f32 %v1750_v8, %v1086_v9  ;;  %v1088_v44 = vpop.f32.mrb[9].mxu1 }
 0xa8e   :  { %v1116_v29 = vadd.f32 %v2295_v42, %v1088_v44 }
 0xa8f   :  { %v1754_v18 = vmul.f32 -1.442695, %v1102_v46 }
 0xa90   :  { %v1092_v15 = vpop.f32.mrb[10].mxu1 }
 0xa91   :  { %2105 = vpow2.f32 %v1754_v18  ;;  %v1103_v26 = vadd.f32 %v1752_v14, %v1092_v15  ;;  %v1094_v20 = vpop.f32.mrb[11].mxu1 }
 0xa92   :  { %v1117_v36 = vadd.f32 %v2295_v42, %v1094_v20  ;;  %v1137_v42 = vpop.permute.xlu0 %1136 }
 0xa93   :  { %v1755_v4 = vmul.f32 -1.442695, %v1103_v26 }
 0xa95   :  { %2107 = vpow2.f32 %v1755_v4 }
 0xa96   :  { %v1139_v51 = vpop.permute.xlu0 %1138 }
 0xa9a   :  { %v2022_v0 = vpop.permute.xlu0 %2021 }
 0xa9b   :  { %v2106_v21 = vpop.eup %2105  ;;  %v2024_v2 = vunpack.i.h.bf16 %v2022_v0  ;;  %v2023_v5 = vunpack.i.l.bf16 %v2022_v0 }
 0xa9c   :  { %v1110_v24 = vadd.f32 1.0, %v2106_v21 }
 0xa9d   :  { %v1184_v11 = vmul.f32 %v2024_v2, %v2347_v23  ;;  %v1164_v13 = vmul.f32 %v2023_v5, %v2344_v19 }
 0xa9e   :  { %2109 = vrcp.f32 %v1110_v24 }
 0xa9f   :  { %v2108_v27 = vpop.eup %2107  ;;  %v1186_v8 = vadd.f32 %v1184_v11, %v1164_v13 }
 0xaa0   :  { %v1111_v28 = vadd.f32 1.0, %v2108_v27 }
 0xaa1   :  { %v1198_v14 = vsub.f32 1.0, %v1186_v8 }
 0xaa2   :  { %2111 = vrcp.f32 %v1111_v28  ;;  %v1764_v28 = vld [vmem:[%s2776_s0 + $0xd0] sm:$0xff] }
 0xaa3   :  { %v1200_v26 = vmul.f32 %v1198_v14, %v2610_v17  ;;  %v1762_v17 = vld [vmem:[%s2776_s0 + $0xc0] sm:$0xff] }
 0xaa8   :  { %v2110_v32 = vpop.eup %2109 }
 0xaa9   :  { %v1118_v34 = vmul.f32 %v2110_v32, %v1116_v29  ;;  %v1124_v49 = vsub.f32 1.0, %v2110_v32  ;;  %v1142_v43 = vmul.f32 %v2110_v32, %v1137_v42 }
 0xaab   :  { %v1120_v35 = vadd.f32 %v1751_v33, %v1118_v34 }
 0xaac   :  { %v2112_v37 = vpop.eup %2111 }
 0xaad   :  { %2113 = vtanh.f32 %v1120_v35  ;;  %v1119_v40 = vmul.f32 %v2112_v37, %v1117_v36  ;;  %v1125_v50 = vsub.f32 1.0, %v2112_v37  ;;  %v1143_v54 = vmul.f32 %v2112_v37, %v1139_v51 }
 0xaae   :  { %v2025_v51 = vpack.i.bf16 %v2405_v30, %v2408_v31 }
 0xaaf   :  { %v1121_v41 = vadd.f32 %v1753_v39, %v1119_v40  ;;  %v2675_v39 = vld [vmem:[%s2777_s3] ss:$0 sm:$0xff] }
 0xab1   :  { %2115 = vtanh.f32 %v1121_v41 }
 0xab7   :  { %v2114_v52 = vpop.eup %2113 }
 0xab8   :  { %1128 = vrot.lane.b32.xlu1 %v2114_v52, %s2144_s18  ;;  %v1763_v52 = vld [vmem:[%s2776_s0 + $0xc8] sm:$0xff] }
 0xabb   :  { %v2116_v55 = vpop.eup %2115 }
 0xabc   :  { %1130 = vrot.lane.b32.xlu1 %v2116_v55, %s2144_s18 }
 0xac0   :  { %2016 = vperm.xlu1 %1969, %v2015_v47  }
 0xb2a   :  { %v1129_v12 = vpop.permute.xlu1 %1128 }
 0xb2b   :  { %v1134_v45 = vmul.f32 %v1129_v12, %v1124_v49  ;;  %v1765_v12 = vld [vmem:[%s2776_s0 + $0xd8] sm:$0xff] }
 0xb2d   :  { %v1144_v62 = vadd.f32 %v1142_v43, %v1134_v45 }
 0xb2e   :  { %v1131_v53 = vpop.permute.xlu1 %1130 }
 0xb2f   :  { %v1135_v58 = vmul.f32 %v1131_v53, %v1125_v50  ;;  %1189 = vrot.lane.b32.xlu1 %v1144_v62, %s2144_s18 }
 0xb31   :  { %v1145_v59 = vadd.f32 %v1143_v54, %v1135_v58 }
 0xb33   :  { %1191 = vrot.lane.b32.xlu0 %v1145_v59, %s2144_s18 }
 0xb3f   :  { %v2017_v22 = vpop.permute.xlu1 %2016 }
 0xb40   :  { %v2019_v1 = vunpack.i.h.bf16 %v2017_v22  ;;  %v2018_v63 = vunpack.i.l.bf16 %v2017_v22 }
 0xb42   :  { %v1183_v6 = vmul.f32 %v2019_v1, %v2347_v23  ;;  %v1163_v7 = vmul.f32 %v2018_v63, %v2344_v19 }
 0xb44   :  { %v1185_v16 = vadd.f32 %v1183_v6, %v1163_v7 }
 0xb46   :  { %v1197_v38 = vsub.f32 1.0, %v1185_v16 }
 0xb48   :  { %v1199_v44 = vmul.f32 %v1197_v38, %v2601_v10  ;;  %v2030_v10 = vpack.i.bf16 %v2365_v25, %v2368_v48 }
 0xba1   :  { %v1190_v9 = vpop.permute.xlu1 %1189 }
 0xba2   :  { %v1195_v46 = vmul.f32 %v1190_v9, %v1185_v16 }
 0xba4   :  { %v2650_v18 = vadd.f32 %v1199_v44, %v1195_v46 }
 0xba5   :  { %v1192_v15 = vpop.permute.xlu0 %1191 }
 0xba6   :  { %v1196_v20 = vmul.f32 %v1192_v15, %v1186_v8  ;;  %1326 = vrot.lane.b32.xlu0 %v2650_v18, %s2144_s18  ;;  %1760 = vmatmul.mubr.msk.f32.vlgmr.msra.gmra.mrb[12].mxu0 %vm27_vm0, %v2650_v18 }
 0xba7   :  { %1280 = vmatprep.mubr.f32.mxu0 %v2142_v3 }
 0xba8   :  { %v2658_v4 = vadd.f32 %v1200_v26, %v1196_v20 }
 0xbaa   :  { %1328 = vrot.lane.b32.xlu0 %v2658_v4, %s2144_s18  ;;  %1761 = vmatmul.mubr.msk.f32.gmra.mrb[14].mxu0 %vm27_vm0, %v2658_v4 }
 0xbae   :  { %2031 = vperm.xlu0 %1963, %v2030_v10  }
 0xc18   :  { %v1327_v53 = vpop.permute.xlu0 %1326 }
 0xc1c   :  { %v1329_v0 = vpop.permute.xlu0 %1328 }
 0xc2d   :  { %v2032_v31 = vpop.permute.xlu0 %2031 }
 0xc2e   :  { %v2034_v16 = vunpack.i.h.bf16 %v2032_v31  ;;  %v2033_v38 = vunpack.i.l.bf16 %v2032_v31 }
 0xc30   :  { %v1374_v46 = vmul.f32 %v2034_v16, %v2347_v23  ;;  %v1354_v44 = vmul.f32 %v2033_v38, %v2344_v19 }
 0xc32   :  { %v1376_v26 = vadd.f32 %v1374_v46, %v1354_v44 }
 0xc79   :  { %v1276_v21 = vpop.f32.mrb[12].mxu0 }
 0xc7a   :  { %v1292_v24 = vadd.f32 %v1762_v17, %v1276_v21  ;;  %v1278_v27 = vpop.f32.mrb[13].mxu0  ;;  %v1388_v21 = vsub.f32 1.0, %v1376_v26 }
 0xc7b   :  { %v1306_v40 = vadd.f32 %v2675_v39, %v1278_v27 }
 0xc7c   :  { %v1766_v29 = vmul.f32 -1.442695, %v1292_v24 }
 0xc7d   :  { %v1282_v32 = vpop.f32.mrb[14].mxu0 }
 0xc7e   :  { %2117 = vpow2.f32 %v1766_v29  ;;  %v1293_v33 = vadd.f32 %v1764_v28, %v1282_v32  ;;  %v1284_v34 = vpop.f32.mrb[15].mxu0  ;;  %v1390_v28 = vmul.f32 %v1388_v21, %v2658_v4  ;;  %v1774_v4 = vld [vmem:[%s2776_s0 + $0xe0] sm:$0xff] }
 0xc7f   :  { %v1307_v42 = vadd.f32 %v2675_v39, %v1284_v34 }
 0xc80   :  { %v1767_v35 = vmul.f32 -1.442695, %v1293_v33 }
 0xc82   :  { %2119 = vpow2.f32 %v1767_v35 }
 0xc88   :  { %v2118_v25 = vpop.eup %2117 }
 0xc89   :  { %v1300_v48 = vadd.f32 1.0, %v2118_v25 }
 0xc8b   :  { %2121 = vrcp.f32 %v1300_v48 }
 0xc8c   :  { %v2120_v36 = vpop.eup %2119 }
 0xc8d   :  { %v1301_v37 = vadd.f32 1.0, %v2120_v36 }
 0xc8f   :  { %2123 = vrcp.f32 %v1301_v37 }
 0xc95   :  { %v2122_v41 = vpop.eup %2121 }
 0xc96   :  { %v1308_v55 = vmul.f32 %v2122_v41, %v1306_v40  ;;  %v1314_v54 = vsub.f32 1.0, %v2122_v41  ;;  %v1332_v59 = vmul.f32 %v2122_v41, %v1327_v53 }
 0xc98   :  { %v1310_v47 = vadd.f32 %v1763_v52, %v1308_v55 }
 0xc99   :  { %v2124_v49 = vpop.eup %2123 }
 0xc9a   :  { %2125 = vtanh.f32 %v1310_v47  ;;  %v1309_v43 = vmul.f32 %v2124_v49, %v1307_v42  ;;  %v1315_v63 = vsub.f32 1.0, %v2124_v49  ;;  %v1333_v5 = vmul.f32 %v2124_v49, %v1329_v0  ;;  %v1775_v42 = vld [vmem:[%s2776_s0 + $0xe8] sm:$0xff] }
 0xc9c   :  { %v1311_v45 = vadd.f32 %v1765_v12, %v1309_v43 }
 0xc9e   :  { %2127 = vtanh.f32 %v1311_v45 }
 0xca4   :  { %v2126_v62 = vpop.eup %2125 }
 0xca5   :  { %1318 = vrot.lane.b32.xlu1 %v2126_v62, %s2144_s18  ;;  %v1777_v62 = vld [vmem:[%s2776_s0 + $0xf8] sm:$0xff] }
 0xca8   :  { %v2128_v50 = vpop.eup %2127 }
 0xca9   :  { %1320 = vrot.lane.b32.xlu1 %v2128_v50, %s2144_s18 }
 0xcad   :  { %2026 = vperm.xlu1 %1969, %v2025_v51  }
 0xd17   :  { %v1319_v58 = vpop.permute.xlu1 %1318 }
 0xd18   :  { %v1324_v22 = vmul.f32 %v1319_v58, %v1314_v54  ;;  %v2035_v58 = vpack.i.bf16 %v2319_v56, %v2322_v57  ;;  %v1592_v56 = vld [vmem:[%s2779_s4 + $0x20] sm:$0xff]  ;;  %v1593_v57 = vld [vmem:[%s2779_s4 + $0x28] sm:$0xff] }
 0xd1a   :  { %v1334_v1 = vadd.f32 %v1332_v59, %v1324_v22  ;;  %v1589_v59 = vld [vmem:[%s2779_s4 + $0x8] sm:$0xff]  ;;  %v1590_v22 = vld [vmem:[%s2779_s4 + $0x10] sm:$0xff] }
 0xd1b   :  { %v1321_v2 = vpop.permute.xlu1 %1320 }
 0xd1c   :  { %v1325_v6 = vmul.f32 %v1321_v2, %v1315_v63  ;;  %1379 = vrot.lane.b32.xlu1 %v1334_v1, %s2144_s18  ;;  %v1591_v63 = vld [vmem:[%s2779_s4 + $0x18] sm:$0xff]  ;;  %v1952_v2 = vpack.c.bf16 %v1593_v57, %v1592_v56 }
 0xd1d   :  { %v1948_v0 = vpack.c.bf16 %v1591_v63, %v1590_v22 }
 0xd1e   :  { %v1335_v7 = vadd.f32 %v1333_v5, %v1325_v6  ;;  %v1594_v5 = vld [vmem:[%s2779_s4 + $0x30] sm:$0xff]  ;;  %v1595_v6 = vld [vmem:[%s2779_s4 + $0x38] sm:$0xff] }
 0xd20   :  { %1381 = vrot.lane.b32.xlu0 %v1335_v7, %s2144_s18  ;;  %v1956_v7 = vpack.c.bf16 %v1595_v6, %v1594_v5 }
 0xd2c   :  { %v2027_v11 = vpop.permute.xlu1 %2026 }
 0xd2d   :  { %v2029_v13 = vunpack.i.h.bf16 %v2027_v11  ;;  %v2028_v30 = vunpack.i.l.bf16 %v2027_v11 }
 0xd2f   :  { %v1373_v8 = vmul.f32 %v2029_v13, %v2347_v23  ;;  %v1353_v9 = vmul.f32 %v2028_v30, %v2344_v19 }
 0xd31   :  { %v1375_v14 = vadd.f32 %v1373_v8, %v1353_v9 }
 0xd33   :  { %v1387_v15 = vsub.f32 1.0, %v1375_v14 }
 0xd35   :  { %v1389_v17 = vmul.f32 %v1387_v15, %v2650_v18  ;;  %v2040_v18 = vpack.i.bf16 %v2332_v60, %v2335_v61 }
 0xd8e   :  { %v1380_v20 = vpop.permute.xlu1 %1379 }
 0xd8f   :  { %v1385_v10 = vmul.f32 %v1380_v20, %v1375_v14 }
 0xd91   :  { %v2696_v24 = vadd.f32 %v1389_v17, %v1385_v10 }
 0xd92   :  { %v1382_v27 = vpop.permute.xlu0 %1381 }
 0xd93   :  { %v1386_v29 = vmul.f32 %v1382_v27, %v1376_v26  ;;  %1516 = vrot.lane.b32.xlu0 %v2696_v24, %s2144_s18  ;;  %1772 = vmatmul.mubr.msk.f32.vlgmr.msra.gmra.mrb[12].mxu1 %vm27_vm0, %v2696_v24 }
 0xd94   :  { %1470 = vmatprep.mubr.f32.mxu1 %v2142_v3  ;;  %v1776_v3 = vld [vmem:[%s2776_s0 + $0xf0] sm:$0xff] }
 0xd95   :  { %v2704_v32 = vadd.f32 %v1390_v28, %v1386_v29 }
 0xd97   :  { %1518 = vrot.lane.b32.xlu0 %v2704_v32, %s2144_s18  ;;  %1773 = vmatmul.mubr.msk.f32.gmra.mrb[14].mxu1 %vm27_vm0, %v2704_v32 }
 0xd9b   :  { %2041 = vperm.xlu0 %1963, %v2040_v18  }
 0xe05   :  { %v1517_v11 = vpop.permute.xlu0 %1516 }
 0xe09   :  { %v1519_v9 = vpop.permute.xlu0 %1518 }
 0xe1a   :  { %v2042_v17 = vpop.permute.xlu0 %2041 }
 0xe1b   :  { %v2044_v21 = vunpack.i.h.bf16 %v2042_v17  ;;  %v2043_v27 = vunpack.i.l.bf16 %v2042_v17 }
 0xe1d   :  { %v1564_v18 = vmul.f32 %v2044_v21, %v2347_v23 }
 0xe66   :  { %v1466_v33 = vpop.f32.mrb[12].mxu1 }
 0xe67   :  { %v1482_v34 = vadd.f32 %v1774_v4, %v1466_v33  ;;  %v1468_v35 = vpop.f32.mrb[13].mxu1  ;;  %v1544_v4 = vmul.f32 %v2043_v27, %v2344_v19 }
 0xe68   :  { %v1496_v55 = vadd.f32 %v2675_v39, %v1468_v35 }
 0xe69   :  { %v1778_v25 = vmul.f32 -1.442695, %v1482_v34  ;;  %v1566_v35 = vadd.f32 %v1564_v18, %v1544_v4 }
 0xe6a   :  { %v1472_v48 = vpop.f32.mrb[14].mxu1 }
 0xe6b   :  { %2129 = vpow2.f32 %v1778_v25  ;;  %v1483_v36 = vadd.f32 %v1776_v3, %v1472_v48  ;;  %v1474_v37 = vpop.f32.mrb[15].mxu1 }
 0xe6c   :  { %v1497_v43 = vadd.f32 %v2675_v39, %v1474_v37  ;;  %v1588_v39 = vld [vmem:[%s2779_s4] sm:$0xff] }
 0xe6d   :  { %v1779_v40 = vmul.f32 -1.442695, %v1483_v36  ;;  %v1944_v1 = vpack.c.bf16 %v1589_v59, %v1588_v39  ;;  %v1578_v36 = vsub.f32 1.0, %v1566_v35 }
 0xe6f   :  { %2131 = vpow2.f32 %v1779_v40  ;;  %1945 = vmatprep.subr.bf16.mxu0 %v1944_v1 }
 0xe70   :  { %1947 = vmatpush3.bf16.msra.mxu0 %v1944_v1 }
 0xe71   :  { %1949 = vmatprep.subr.bf16.mxu0 %v1948_v0 }
 0xe74   :  { %1951 = vmatpush3.bf16.msra.mxu0 %v1948_v0 }
 0xe75   :  { %v2130_v60 = vpop.eup %2129  ;;  %1953 = vmatprep.subr.bf16.mxu0 %v1952_v2 }
 0xe76   :  { %v1490_v61 = vadd.f32 1.0, %v2130_v60  ;;  %v1580_v60 = vmul.f32 %v1578_v36, %v2704_v32 }
 0xe78   :  { %2133 = vrcp.f32 %v1490_v61  ;;  %1955 = vmatpush3.bf16.msra.mxu0 %v1952_v2 }
 0xe79   :  { %v2132_v41 = vpop.eup %2131  ;;  %1957 = vmatprep.subr.bf16.mxu0 %v1956_v7 }
 0xe7a   :  { %v1491_v52 = vadd.f32 1.0, %v2132_v41 }
 0xe7c   :  { %2135 = vrcp.f32 %v1491_v52  ;;  %1959 = vmatpush3.bf16.msra.mxu0 %v1956_v7 }
 0xe82   :  { %v2134_v47 = vpop.eup %2133 }
 0xe83   :  { %v1498_v49 = vmul.f32 %v2134_v47, %v1496_v55  ;;  %v1504_v13 = vsub.f32 1.0, %v2134_v47  ;;  %v1522_v31 = vmul.f32 %v2134_v47, %v1517_v11 }
 0xe85   :  { %v1500_v12 = vadd.f32 %v1775_v42, %v1498_v49 }
 0xe86   :  { %v2136_v45 = vpop.eup %2135 }
 0xe87   :  { %2137 = vtanh.f32 %v1500_v12  ;;  %v1499_v50 = vmul.f32 %v2136_v45, %v1497_v43  ;;  %v1505_v8 = vsub.f32 1.0, %v2136_v45  ;;  %v1523_v44 = vmul.f32 %v2136_v45, %v1519_v9 }
 0xe89   :  { %v1501_v51 = vadd.f32 %v1777_v62, %v1499_v50 }
 0xe8b   :  { %2139 = vtanh.f32 %v1501_v51 }
 0xe91   :  { %v2138_v53 = vpop.eup %2137 }
 0xe92   :  { %1508 = vrot.lane.b32.xlu1 %v2138_v53, %s2144_s18 }
 0xe95   :  { %v2140_v54 = vpop.eup %2139 }
 0xe96   :  { %1510 = vrot.lane.b32.xlu1 %v2140_v54, %s2144_s18 }
 0xe9a   :  { %2036 = vperm.xlu1 %1969, %v2035_v58  }
 0xf04   :  { %v1509_v30 = vpop.permute.xlu1 %1508 }
 0xf05   :  { %v1514_v16 = vmul.f32 %v1509_v30, %v1504_v13 }
 0xf07   :  { %v1524_v38 = vadd.f32 %v1522_v31, %v1514_v16 }
 0xf08   :  { %v1511_v46 = vpop.permute.xlu1 %1510 }
 0xf09   :  { %v1515_v14 = vmul.f32 %v1511_v46, %v1505_v8  ;;  %1569 = vrot.lane.b32.xlu1 %v1524_v38, %s2144_s18 }
 0xf0b   :  { %v1525_v15 = vadd.f32 %v1523_v44, %v1515_v14 }
 0xf0d   :  { %1571 = vrot.lane.b32.xlu0 %v1525_v15, %s2144_s18 }
 0xf19   :  { %v2037_v26 = vpop.permute.xlu1 %2036 }
 0xf1a   :  { %v2039_v20 = vunpack.i.h.bf16 %v2037_v26  ;;  %v2038_v10 = vunpack.i.l.bf16 %v2037_v26 }
 0xf1c   :  { %v1563_v28 = vmul.f32 %v2039_v20, %v2347_v23  ;;  %v1543_v29 = vmul.f32 %v2038_v10, %v2344_v19  ;;  %v1784_v19 = vld [vmem:[%s2780_s5] ss:$0 sm:$0xff] }
 0xf1e   :  { %v1565_v33 = vadd.f32 %v1563_v28, %v1543_v29 }
 0xf20   :  { %v1577_v34 = vsub.f32 1.0, %v1565_v33 }
 0xf22   :  { %v1579_v48 = vmul.f32 %v1577_v34, %v2696_v24 }
 0xf7b   :  { %v1570_v3 = vpop.permute.xlu1 %1569 }
 0xf7c   :  { %v1575_v25 = vmul.f32 %v1570_v3, %v1565_v33 }
 0xf7e   :  { %v1581_v37 = vadd.f32 %v1579_v48, %v1575_v25 }
 0xf7f   :  { %v1572_v40 = vpop.permute.xlu0 %1571 }
 0xf80   :  { %1583 = vst.msk [vmem:[#allocation2] sm:$0xff] %vm27_vm0, %v1581_v37  ;;  %v1576_v61 = vmul.f32 %v1572_v40, %v1566_v35  ;;  %1813 = vmatprep.mubr.msk.f32.mxu0 %vm27_vm0, %v1581_v37 }
 0xf82   :  { %v1582_v23 = vadd.f32 %v1580_v60, %v1576_v61 }
 0xf84   :  { %1584 = vst.msk [vmem:[#allocation2 + $0x8] sm:$0xff] %vm27_vm0, %v1582_v23  ;;  %1814 = vmatmul.mubr.msk.f32.vlgmr.msra.gmra.mrb[16].mxu0 %vm27_vm0, %v1582_v23 }
0x1057   :  { %v1815_v24 = vpop.f32.mrb[16].mxu0 }
0x1058   :  { %v1681_v41 = vadd.f32 %v1815_v24, %v1784_v19  ;;  %v1675_v52 = vpop.f32.mrb[17].mxu0 }
0x1059   :  { %v1676_v55 = vadd.f32 %v1784_v19, %v1675_v52 }
0x105a   :  { %1685 = vst [vmem:[%s2781_s6 + $0x8] sm:$0xff] %v1681_v41 }
0x105b   :  { %1684 = vst [vmem:[%s2781_s6] sm:$0xff] %v1676_v55 }

</bundles_post_ra>
